<compile_context>
chip_gen: v7x
topology: tpu7x:2x2x1
jax: 0.10.0
libtpu: 0.0.40
codegen_flags: <defaults>
</compile_context>

<pallas_src>
import functools

import jax
import jax.numpy as jnp
from jax import lax
from jax.experimental import pallas as pl
from jax.experimental.pallas import tpu as pltpu


def _round_up(x, m):
    return ((x + m - 1) // m) * m


def _cdiv(a, b):
    return (a + b - 1) // b


def _time2vec_kernel(tau_ref, wexp_ref, b_ref, lin_ref, o_ref, *, use_sin: bool):
    # tau_ref : (PACK_PAD, TN)  transposed packed tau slab (zero-padded sublanes)
    # wexp_ref: (PACK_PAD, LW)  block-diagonal expanded weights (resident)
    # b_ref   : (1, LW)         tiled bias (resident)
    # lin_ref : (1, LW)         int32 mask: 1 on the linear (v2) channel of each group
    # o_ref   : (TN, LW)        lane-dense output tile
    g = pl.reciprocal(tau_ref[...] + 1.0, approx=False)      # _g(times) = 1/(times+1)

    # Rank-PACK matmul: contracts over the (zero-padded) sublane axis of g, so
    # z[r, p*E + j] = g[p, r] * w[j]; padded sublanes multiply zero weight rows.
    z = lax.dot_general(
        g, wexp_ref[...],
        dimension_numbers=(((0,), (0,)), ((), ())),
        preferred_element_type=jnp.float32,
    ) + b_ref[...]

    act = jnp.sin(z) if use_sin else jnp.cos(z)               # EUP slot
    # Channels [0, E-2] of each group are periodic (v1); channel E-1 is linear (v2).
    o_ref[...] = jnp.where(lin_ref[...] != 0, z, act).astype(o_ref.dtype)


def time2vec_forward(tau, w0, b0, w1, b1, *, window_size, activation="sin", row_tile=8192):
    """tau: (B, W) float32. Returns (B, W, E) with E = w1.shape[-1] + 1."""
    assert tau.shape[-1] == window_size
    batch = tau.shape[0]
    e = w1.shape[-1] + 1
    n = batch * window_size

    # Lane packing: PACK consecutive flat rows share one 128-lane output row ->
    # unmasked full-vreg stores, 512 B DMA rows.
    if e <= 128 and 128 % e == 0:
        pack = 128 // e
    else:
        pack = 1  # perf cliff: masked/narrow stores when E does not divide 128
    lane_width = pack * e
    pack_pad = _round_up(pack, 8)       # sublane-align the matmul contraction axis

    # Packed-row geometry. tn is both the output sublane extent and the tau lane
    # extent per grid step -> multiple of 128.
    np_rows = _cdiv(n, pack)
    tn = min(row_tile, _round_up(np_rows, 128))
    # v7x megacore: keep >= 2 parallel grid steps when there is enough work.
    if np_rows > 256 and _cdiv(np_rows, tn) < 2:
        tn = max(128, _round_up(_cdiv(np_rows, 2), 128))
    num_tiles = _cdiv(np_rows, tn)
    np_padded = num_tiles * tn

    # tau -> transposed (PACK_PAD, NP) slab. Padded entries are 0 -> g = 1 (finite);
    # they either hit zero weight rows (sublane pad) or are sliced away (row pad).
    tau_flat = tau.reshape(-1).astype(jnp.float32)
    pad_amt = np_padded * pack - n
    if pad_amt:
        tau_flat = jnp.pad(tau_flat, (0, pad_amt))
    tau_t = tau_flat.reshape(np_padded, pack).T                       # (pack, NP)
    tau_t = jnp.pad(tau_t, ((0, pack_pad - pack), (0, 0)))            # (PACK_PAD, NP)

    # Fuse [w1, w0] / [b1, b0] (the reference concat becomes the lin mask), then
    # expand w into a block-diagonal (PACK_PAD, LW) matrix for the in-kernel matmul.
    w_full = jnp.concatenate([w1, w0], axis=-1).reshape(1, e).astype(jnp.float32)
    b_full = jnp.concatenate([b1, b0], axis=-1).reshape(1, e).astype(jnp.float32)
    eye = jnp.eye(pack, dtype=jnp.float32)
    wexp = (eye[:, :, None] * w_full[None, :, :]).reshape(pack, lane_width)
    wexp = jnp.pad(wexp, ((0, pack_pad - pack), (0, 0)))              # (PACK_PAD, LW)
    b_tiled = jnp.tile(b_full, (1, pack))                             # (1, LW)
    lin = jnp.tile((jnp.arange(e) == e - 1).astype(jnp.int32), pack).reshape(1, lane_width)

    kernel = functools.partial(_time2vec_kernel, use_sin=(activation == "sin"))

    out = pl.pallas_call(
        kernel,
        out_shape=jax.ShapeDtypeStruct((np_padded, lane_width), jnp.float32),
        grid=(num_tiles,),
        in_specs=[
            pl.BlockSpec((pack_pad, tn), lambda i: (0, i)),            # tau slab (tiled)
            pl.BlockSpec((pack_pad, lane_width), lambda i: (0, 0)),    # Wexp (resident)
            pl.BlockSpec((1, lane_width), lambda i: (0, 0)),           # bias (resident)
            pl.BlockSpec((1, lane_width), lambda i: (0, 0)),           # linear mask (resident)
        ],
        out_specs=pl.BlockSpec((tn, lane_width), lambda i: (i, 0)),
        compiler_params=pltpu.CompilerParams(
            dimension_semantics=("parallel",),
            # Explicit scoped-VMEM budget: tn=8192 needs ~17 MiB incl. temps and
            # double buffering; 32 MiB covers v5e's 16 MiB default and leaves
            # headroom within v7x's 64 MiB physical VMEM.
            vmem_limit_bytes=32 * 1024 * 1024,
        ),
        cost_estimate=pl.CostEstimate(
            flops=2 * np_padded * pack_pad * lane_width + 2 * np_padded * lane_width,
            transcendentals=np_padded * lane_width + np_padded * pack_pad,
            bytes_accessed=4 * pack_pad * np_padded + 4 * np_padded * lane_width,
        ),
    )(tau_t, wexp, b_tiled, lin)

    # Un-pack lane groups (free row-major reshape), drop padding, restore (B, W, E).
    return out.reshape(np_padded * pack, e)[:n].reshape(batch, window_size, e)


def time2vec_reference(tau, w0, b0, w1, b1, *, window_size, activation="sin"):
    f = jnp.sin if activation == "sin" else jnp.cos
    g = 1.0 / (tau + 1.0)
    t = g.reshape(-1, window_size, 1)
    v1 = f(jnp.matmul(t, w1) + b1)
    v2 = jnp.matmul(t, w0) + b0
    return jnp.concatenate([v1, v2], axis=-1)


if __name__ == "__main__":
    key = jax.random.PRNGKey(0)
    k_tau, k_w0, k_b0, k_w1, k_b1, k_tau2 = jax.random.split(key, 6)

    # Small shapes implied by the module: batch=2, window_size=8, embedding_size=32.
    B, W, E = 2, 8, 32
    tau = jax.random.uniform(k_tau, (B, W), dtype=jnp.float32)      # "times", positive
    w0 = jax.random.normal(k_w0, (1, 1), dtype=jnp.float32)
    b0 = jax.random.normal(k_b0, (1, 1), dtype=jnp.float32)
    w1 = jax.random.normal(k_w1, (1, E - 1), dtype=jnp.float32)
    b1 = jax.random.normal(k_b1, (1, E - 1), dtype=jnp.float32)

    for act in ("sin", "cos"):
        out = time2vec_forward(tau, w0, b0, w1, b1, window_size=W, activation=act)
        out = jax.block_until_ready(out)
        ref = time2vec_reference(tau, w0, b0, w1, b1, window_size=W, activation=act)
        assert out.shape == (B, W, E)
        assert jnp.allclose(out, ref, atol=1e-5, rtol=1e-5)

    # Slightly larger case: exercises row padding, the multi-tile grid and the
    # >=2-parallel-steps clamp (num_tiles == 2 here).
    B2, W2 = 4, 300
    tau2 = jax.random.uniform(k_tau2, (B2, W2), dtype=jnp.float32)
    out2 = time2vec_forward(tau2, w0, b0, w1, b1, window_size=W2, activation="sin")
    out2 = jax.block_until_ready(out2)
    ref2 = time2vec_reference(tau2, w0, b0, w1, b1, window_size=W2, activation="sin")
    assert out2.shape == (B2, W2, E)
    assert jnp.allclose(out2, ref2, atol=1e-5, rtol=1e-5)

    print("KERNEL_OK")
</pallas_src>

<mosaic_0001>
module attributes {stable_mosaic.version = 11 : i64} {
  func.func @_time2vec_kernel(%arg0: i32, %arg1: memref<8x128xf32, #tpu.memory_space<vmem>>, %arg2: memref<8x128xf32, #tpu.memory_space<vmem>>, %arg3: memref<1x128xf32, #tpu.memory_space<vmem>>, %arg4: memref<1x128xi32, #tpu.memory_space<vmem>>, %arg5: memref<128x128xf32, #tpu.memory_space<vmem>>) attributes {dimension_semantics = [#tpu.dimension_semantics<parallel>], iteration_bounds = array<i64: 1>, scalar_prefetch = 0 : i64, scratch_operands = 0 : i64, tpu.core_type = #tpu.core_type<tc>, window_params = [{transform_indices = @transform_0, window_bounds = array<i64: 8, 128>}, {pipeline_mode = #tpu.pipeline_mode<synchronous>, transform_indices = @transform_1, window_bounds = array<i64: 8, 128>}, {pipeline_mode = #tpu.pipeline_mode<synchronous>, transform_indices = @transform_2, window_bounds = array<i64: 1, 128>}, {pipeline_mode = #tpu.pipeline_mode<synchronous>, transform_indices = @transform_3, window_bounds = array<i64: 1, 128>}, {transform_indices = @transform_4, window_bounds = array<i64: 128, 128>}]} {
    %c0 = arith.constant 0 : index
    %c0_0 = arith.constant 0 : index
    %0 = vector.load %arg1[%c0, %c0_0] : memref<8x128xf32, #tpu.memory_space<vmem>>, vector<8x128xf32>
    %cst = arith.constant 1.000000e+00 : f32
    %1 = vector.broadcast %cst : f32 to vector<8x128xf32>
    %2 = arith.addf %0, %1 : vector<8x128xf32>
    %3 = tpu.reciprocal %2 : vector<8x128xf32> -> vector<8x128xf32>
    %c0_1 = arith.constant 0 : index
    %c0_2 = arith.constant 0 : index
    %4 = vector.load %arg2[%c0_1, %c0_2] : memref<8x128xf32, #tpu.memory_space<vmem>>, vector<8x128xf32>
    %cst_3 = arith.constant dense<0.000000e+00> : vector<128x128xf32>
    %5 = tpu.matmul %3, %4, %cst_3 {dimension_numbers = #tpu.dot_dimension_numbers<[0], [0], [1], [1], [0, 1, 1, 1], [], []>} : vector<8x128xf32>, vector<8x128xf32>, vector<128x128xf32> -> vector<128x128xf32>
    %c0_4 = arith.constant 0 : index
    %c0_5 = arith.constant 0 : index
    %6 = vector.load %arg3[%c0_4, %c0_5] : memref<1x128xf32, #tpu.memory_space<vmem>>, vector<1x128xf32>
    %7 = vector.broadcast %6 : vector<1x128xf32> to vector<128x128xf32>
    %8 = arith.addf %5, %7 : vector<128x128xf32>
    %9 = math.sin %8 : vector<128x128xf32>
    %c0_6 = arith.constant 0 : index
    %c0_7 = arith.constant 0 : index
    %10 = vector.load %arg4[%c0_6, %c0_7] : memref<1x128xi32, #tpu.memory_space<vmem>>, vector<1x128xi32>
    %c0_i32 = arith.constant 0 : i32
    %11 = vector.broadcast %c0_i32 : i32 to vector<1x128xi32>
    %12 = arith.cmpi ne, %10, %11 : vector<1x128xi32>
    %13 = vector.shape_cast %12 : vector<1x128xi1> to vector<1x128xi1>
    %14 = vector.broadcast %13 : vector<1x128xi1> to vector<128x128xi1>
    %15 = arith.select %14, %8, %9 : vector<128x128xi1>, vector<128x128xf32>
    %c0_8 = arith.constant 0 : index
    %c0_9 = arith.constant 0 : index
    %16 = vector.load %arg5[%c0_8, %c0_9] : memref<128x128xf32, #tpu.memory_space<vmem>>, vector<128x128xf32>
    tpu.vector_store %arg5[%c0_8, %c0_9], %15 {strides = array<i32>} : memref<128x128xf32, #tpu.memory_space<vmem>>, vector<128x128xf32>,
    return
  }
  func.func @transform_0(%arg0: i32) -> (i32, i32) {
    %c0_i32 = arith.constant 0 : i32
    %c0_i32_0 = arith.constant 0 : i32
    return %c0_i32, %arg0 : i32, i32
  }
  func.func @transform_1(%arg0: i32) -> (i32, i32) {
    %c0_i32 = arith.constant 0 : i32
    %c0_i32_0 = arith.constant 0 : i32
    %c0_i32_1 = arith.constant 0 : i32
    return %c0_i32, %c0_i32_0 : i32, i32
  }
  func.func @transform_2(%arg0: i32) -> (i32, i32) {
    %c0_i32 = arith.constant 0 : i32
    %c0_i32_0 = arith.constant 0 : i32
    %c0_i32_1 = arith.constant 0 : i32
    return %c0_i32, %c0_i32_0 : i32, i32
  }
  func.func @transform_3(%arg0: i32) -> (i32, i32) {
    %c0_i32 = arith.constant 0 : i32
    %c0_i32_0 = arith.constant 0 : i32
    %c0_i32_1 = arith.constant 0 : i32
    return %c0_i32, %c0_i32_0 : i32, i32
  }
  func.func @transform_4(%arg0: i32) -> (i32, i32) {
    %c0_i32 = arith.constant 0 : i32
    %c0_i32_0 = arith.constant 0 : i32
    return %arg0, %c0_i32 : i32, i32
  }
}

</mosaic_0001>

<bundles_post_ra>
// kernel: tpu_custom_call.1
= control target key start
LH: loop header
LB: loop body
LE: loop exit
PB: predicated region body
PF: predicated region fallthrough
CT: control target
= control target key end

     0   :  { %9 = vsyncpa [#allocation3], 0  ;;  %s3732_s0 = inlined_call_operand.hbm [shape: f32[8,128], index: 0, kind: input, shape index: {}]   ;;  %s3733_s1 = inlined_call_operand.hbm [shape: f32[8,128], index: 1, kind: input, shape index: {}]   ;;  %s3734_s2 = inlined_call_operand.vmem [shape: f32[1,128], index: 2, kind: input, shape index: {}]   ;;  %s3735_s3 = inlined_call_operand.vmem [shape: s32[1,128], index: 3, kind: input, shape index: {}]   ;;  %s3736_s4 = inlined_call_operand.hbm [shape: f32[128,128], index: 4, kind: output, shape index: {}]  }
   0x1   :  { %10 = vsyncpa [#allocation6], 0 }
   0x2   :  { %11 = vsyncpa [#allocation4], 0  ;;  %s2344_s15 = smov [#allocation2]   ;;  %s2345_s17 = smov [#allocation5]  }
   0x3   :  { %s18_s16 = sshll.u32 %s2344_s15, 4  ;;  %s28_s18 = sshll.u32 %s2345_s17, 4  ;;  %s19_s16 = int_to_ptr.vmem [resolvable:$true] %s18_s16  ;;  %s29_s18 = int_to_ptr.vmem [resolvable:$true] %s28_s18 }
   0x4   :  { %s2272_s21 = scalar_lea.hbm %s3732_s0, 128 }
   0x5   :  { %p2273_p0 = scmp.ne.s32.totalorder %s3732_s0, %s2272_s21  ;;  %p2276_p1 = scmp.lt.u32.totalorder %s2272_s21, %s3732_s0 }
   0x7   :  { %p2278_p2 = pnand %p2276_p1, %p2273_p0 }
   0x9   :  { %2281 = shalt.err (!%p2278_p2)
}
   0xa   :  { %s2282_s26 = scalar_lea.vmem %s19_s16, 128  ;;  %p2287_p4 = scmp.lt.s32.totalorder %s19_s16, %s19_s16 }
   0xb   :  { %p2283_p3 = scmp.ne.s32.totalorder %s19_s16, %s2282_s26  ;;  %p2288_p5 = scmp.lt.s32.totalorder %s2282_s26, %s2282_s26 }
   0xd   :  { %p2289_p6 = por %p2288_p5, %p2287_p4 }
   0xf   :  { %p2290_p7 = pnand %p2289_p6, %p2283_p3 }
  0x11   :  { %2293 = shalt.err (!%p2290_p7)
}
  0x12   :  { %21 = dma.hbm_to_vmem [thread:$0]  %s3732_s0, 128, %s19_s16, [#allocation3]  }
  0x13   :  { %s2294_s5 = scalar_lea.hbm %s3733_s1, 128 }
  0x14   :  { %p2295_p8 = scmp.ne.s32.totalorder %s3733_s1, %s2294_s5  ;;  %p2298_p9 = scmp.lt.u32.totalorder %s2294_s5, %s3733_s1 }
  0x16   :  { %p2300_p10 = pnand %p2298_p9, %p2295_p8 }
  0x18   :  { %2303 = shalt.err (!%p2300_p10)
}
  0x19   :  { %s2304_s10 = scalar_lea.vmem %s29_s18, 128  ;;  %p2309_p12 = scmp.lt.s32.totalorder %s29_s18, %s29_s18 }
  0x1a   :  { %p2305_p11 = scmp.ne.s32.totalorder %s29_s18, %s2304_s10  ;;  %p2310_p13 = scmp.lt.s32.totalorder %s2304_s10, %s2304_s10 }
  0x1c   :  { %p2311_p0 = por %p2310_p13, %p2309_p12 }
  0x1e   :  { %p2312_p1 = pnand %p2311_p0, %p2305_p11 }
  0x20   :  { %2315 = shalt.err (!%p2312_p1)
}
  0x21   :  { %31 = dma.hbm_to_vmem [thread:$0]  %s3733_s1, 128, %s29_s18, [#allocation6]  }
  0x22   :  { %2338 = dma.done.wait [#allocation3], 128  }
  0x23   :  { %2339 = vsyncadd [#allocation3], 4294967168 }
  0x24   :  { %2340 = dma.done.wait [#allocation6], 128  }
  0x25   :  { %2341 = vsyncadd [#allocation6], 4294967168  ;;  %v42_v0 = vld [vmem:[#allocation2] sm:$0xff]  ;;  %v45_v3 = vld [vmem:[#allocation5] sm:$0xff]  ;;  %vm85_vm0 = vcmask 64512   ;;  %v1946_v44 = vlaneseq }
  0x26   :  { %v43_v1 = vadd.f32 1.0, %v42_v0  ;;  %2099 = vmatprep.subr.mxu0 %v45_v3  ;;  %2125 = vmatprep.subr.mxu1 %v45_v3  ;;  %v2424_v20 = vld [vmem:[%s3734_s2] ss:$0 sm:$0xff]  ;;  %v2346_v54 = vmov 683565275  }
  0x27   :  { %2100 = vmatpush3.msra.mxu0 %v45_v3  ;;  %2126 = vmatpush3.msra.mxu1 %v45_v3  ;;  %v2347_v58 = vmov 2475754826   ;;  %v2348_v60 = vmov 2131351028   ;;  %v2349_v62 = vmov 2102212464  }
  0x28   :  { %2204 = vrcp.f32 %v43_v1  ;;  %v2350_v0 = vmov 920167782  }
  0x32   :  { %v2205_v2 = vpop.eup %2204 }
  0x33   :  { %53 = vxpose.xlu0.b32.start.end [1/1] (short) %v2205_v2, 128 }
  0xb3   :  { %v69_v4 = vpop.trf.xlu0 }
  0xb4   :  { %2101 = vmatprep.mubr.msk.f32.mxu0 %vm85_vm0, %v69_v4 }
  0xb7   :  { %v70_v5 = vpop.trf.xlu0 }
  0xb8   :  { %2102 = vmatmul.mubr.msk.f32.vlgmr.msra.gmra.mrb[0].mxu0 %vm85_vm0, %v70_v5 }
  0xbb   :  { %v71_v6 = vpop.trf.xlu0 }
  0xbc   :  { %2104 = vmatprep.mubr.msk.f32.mxu0 %vm85_vm0, %v71_v6 }
  0xbf   :  { %v72_v7 = vpop.trf.xlu0 }
  0xc0   :  { %2105 = vmatmul.mubr.msk.f32.gmra.mrb[2].mxu0 %vm85_vm0, %v72_v7 }
  0xc3   :  { %v73_v8 = vpop.trf.xlu0 }
  0xc4   :  { %2107 = vmatprep.mubr.msk.f32.mxu0 %vm85_vm0, %v73_v8 }
  0xc7   :  { %v74_v9 = vpop.trf.xlu0 }
  0xc8   :  { %2108 = vmatmul.mubr.msk.f32.gmra.mrb[4].mxu0 %vm85_vm0, %v74_v9  ;;  %v2351_v9 = vmov 1326507024  }
  0xcb   :  { %v75_v10 = vpop.trf.xlu0 }
  0xcc   :  { %2110 = vmatprep.mubr.msk.f32.mxu0 %vm85_vm0, %v75_v10 }
  0xcf   :  { %v76_v11 = vpop.trf.xlu0 }
  0xd0   :  { %2111 = vmatmul.mubr.msk.f32.gmra.mrb[6].mxu0 %vm85_vm0, %v76_v11 }
  0xd3   :  { %v77_v12 = vpop.trf.xlu0 }
  0xd4   :  { %2113 = vmatprep.mubr.msk.f32.mxu1 %vm85_vm0, %v77_v12 }
  0xd7   :  { %v78_v13 = vpop.trf.xlu0 }
  0xd8   :  { %2114 = vmatmul.mubr.msk.f32.vlgmr.msra.gmra.mrb[0].mxu1 %vm85_vm0, %v78_v13 }
  0xdb   :  { %v79_v14 = vpop.trf.xlu0 }
  0xdc   :  { %2116 = vmatprep.mubr.msk.f32.mxu1 %vm85_vm0, %v79_v14 }
  0xdf   :  { %v80_v15 = vpop.trf.xlu0 }
  0xe0   :  { %2117 = vmatmul.mubr.msk.f32.gmra.mrb[2].mxu1 %vm85_vm0, %v80_v15 }
  0xe3   :  { %v81_v16 = vpop.trf.xlu0 }
  0xe4   :  { %2119 = vmatprep.mubr.msk.f32.mxu1 %vm85_vm0, %v81_v16 }
  0xe7   :  { %v82_v17 = vpop.trf.xlu0 }
  0xe8   :  { %2120 = vmatmul.mubr.msk.f32.gmra.mrb[4].mxu1 %vm85_vm0, %v82_v17 }
  0xeb   :  { %v83_v18 = vpop.trf.xlu0 }
  0xec   :  { %2122 = vmatprep.mubr.msk.f32.mxu1 %vm85_vm0, %v83_v18 }
  0xef   :  { %v84_v19 = vpop.trf.xlu0 }
  0xf0   :  { %2123 = vmatmul.mubr.msk.f32.gmra.mrb[6].mxu1 %vm85_vm0, %v84_v19 }
 0x18b   :  { %v2103_v21 = vpop.f32.mrb[0].mxu0 }
 0x18c   :  { %v2427_v22 = vadd.f32 %v2103_v21, %v2424_v20  ;;  %v200_v23 = vpop.f32.mrb[1].mxu0 }
 0x18d   :  { %v2430_v24 = vadd.f32 %v2424_v20, %v200_v23 }
 0x18e   :  { %v383_v25 = vand.u32 2147483647, %v2427_v22  ;;  %v386_v26 = vand.u32 2139095040, %v2427_v22  ;;  %vm385_vm15 = vcmp.lt.s32.totalorder %v2427_v22, 0 }
 0x18f   :  { %v279_v27 = vand.u32 2147483647, %v2430_v24  ;;  %v282_v28 = vand.u32 2139095040, %v2430_v24 }
 0x190   :  { %v387_v29 = vshrl.u32 %v386_v26, 23  ;;  %v390_v30 = vand.u32 8388607, %v383_v25  ;;  %vm2553_vm0 = vcmp.le.f32.partialorder %v383_v25, 0.7853982 }
 0x191   :  { %v283_v31 = vshrl.u32 %v282_v28, 23  ;;  %v286_v32 = vand.u32 8388607, %v279_v27 }
 0x192   :  { %v2022_v33 = vadd.s32 4294967169, %v387_v29  ;;  %v391_v36 = vor.u32 8388608, %v390_v30 }
 0x193   :  { %v2018_v34 = vadd.s32 4294967169, %v283_v31  ;;  %v2106_v35 = vpop.f32.mrb[2].mxu0  ;;  %v287_v40 = vor.u32 8388608, %v286_v32 }
 0x194   :  { %v393_v37 = vadd.s32 1, %v2022_v33  ;;  %v2441_v38 = vadd.f32 %v2106_v35, %v2424_v20  ;;  %v210_v39 = vpop.f32.mrb[3].mxu0  ;;  %v2444_v47 = vshll.u32 %v391_v36, 8 }
 0x195   :  { %v289_v41 = vadd.s32 1, %v2018_v34  ;;  %v2448_v50 = vshll.u32 %v287_v40, 8  ;;  %v2452_v52 = vadd.f32 %v2424_v20, %v210_v39 }
 0x196   :  { %vm394_vm1 = vcmp.gt.s32.totalorder %v393_v37, 0  ;;  %v594_v42 = vand.u32 2139095040, %v2441_v38  ;;  %v591_v51 = vand.u32 2147483647, %v2441_v38 }
 0x197   :  { %v395_v43 = vsel %vm394_vm1, %v393_v37, 0  ;;  %vm290_vm2 = vcmp.gt.s32.totalorder %v289_v41, 0  ;;  %vm281_vm1 = vcmp.lt.s32.totalorder %v2430_v24, 0 }
 0x198   :  { %v396_v45 = vshrl.u32 %v395_v43, 5  ;;  %v397_v46 = vand.u32 31, %v395_v43  ;;  %v291_v48 = vsel %vm290_vm2, %v289_v41, 0  ;;  %v2455_v57 = vshrl.u32 %v594_v42, 23 }
 0x199   :  { %v2446_v49 = vshrl.u32 %v291_v48, 5  ;;  %v293_v56 = vand.u32 31, %v291_v48 }
 0x19a   :  { %v398_v53 = vsub.s32 32, %v397_v46  ;;  %v400_v55 = vshll.u32 %v2346_v54, %v397_v46  ;;  %v403_v59 = vshll.u32 %v2347_v58, %v397_v46  ;;  %v406_v61 = vshll.u32 %v2348_v60, %v397_v46 }
 0x19b   :  { %v409_v63 = vshll.u32 %v2349_v62, %v397_v46  ;;  %v412_v1 = vshll.u32 %v2350_v0, %v397_v46  ;;  %v2461_v2 = vpop.f32.mrb[4].mxu0  ;;  %vm415_vm3 = vcmp.lt.s32.totalorder %v396_v45, 1  ;;  %vm416_vm4 = vcmp.lt.s32.totalorder %v396_v45, 2 }
 0x19c   :  { %v401_v3 = vshrl.u32 %v2347_v58, %v398_v53  ;;  %v404_v4 = vshrl.u32 %v2348_v60, %v398_v53  ;;  %v407_v5 = vshrl.u32 %v2349_v62, %v398_v53  ;;  %v2466_v6 = vpop.f32.mrb[5].mxu0  ;;  %v399_v7 = vshrl.u32 %v2346_v54, %v398_v53 }
 0x19d   :  { %v410_v8 = vshrl.u32 %v2350_v0, %v398_v53  ;;  %v413_v10 = vshrl.u32 %v2351_v9, %v398_v53  ;;  %v294_v14 = vsub.s32 32, %v293_v56  ;;  %vm417_vm5 = vcmp.lt.s32.totalorder %v396_v45, 3 }
 0x19e   :  { %v402_v11 = vor.u32 %v401_v3, %v400_v55  ;;  %v405_v12 = vor.u32 %v404_v4, %v403_v59  ;;  %v408_v13 = vor.u32 %v407_v5, %v406_v61  ;;  %vm418_vm6 = vcmp.lt.s32.totalorder %v396_v45, 4 }
 0x19f   :  { %v411_v15 = vor.u32 %v410_v8, %v409_v63  ;;  %v414_v16 = vor.u32 %v413_v10, %v412_v1  ;;  %v296_v29 = vshll.u32 %v2346_v54, %v293_v56  ;;  %v297_v32 = vshrl.u32 %v2347_v58, %v294_v14 }
 0x1a0   :  { %v419_v17 = vsel %vm415_vm3, %v399_v7, %v402_v11  ;;  %v420_v18 = vsel %vm418_vm6, %v408_v13, 2102212464  ;;  %v423_v19 = vsel %vm415_vm3, %v402_v11, %v405_v12  ;;  %v427_v21 = vsel %vm415_vm3, %v405_v12, %v408_v13 }
 0x1a1   :  { %v421_v23 = vsel %vm417_vm5, %v405_v12, %v420_v18  ;;  %v424_v26 = vsel %vm418_vm6, %v411_v15, 920167782  ;;  %v428_v28 = vsel %vm418_vm6, %v414_v16, 1326507024  ;;  %v299_v33 = vshll.u32 %v2347_v58, %v293_v56 }
 0x1a2   :  { %v425_v30 = vsel %vm417_vm5, %v408_v13, %v424_v26  ;;  %v429_v31 = vsel %vm417_vm5, %v411_v15, %v428_v28  ;;  %v422_v34 = vsel %vm416_vm4, %v419_v17, %v421_v23  ;;  %v300_v37 = vshrl.u32 %v2348_v60, %v294_v14 }
 0x1a3   :  { %v426_v35 = vsel %vm416_vm4, %v423_v19, %v425_v30  ;;  %v430_v36 = vsel %vm416_vm4, %v427_v21, %v429_v31  ;;  %v2481_v39 = vpop.f32.mrb[6].mxu0  ;;  %v298_v48 = vor.u32 %v297_v32, %v296_v29  ;;  %v302_v45 = vshll.u32 %v2348_v60, %v293_v56 }
 0x1a4   :  { %v2484_v40 = vmul.u32.u64.low %v2444_v47, %v430_v36  ;;  %v2485_v41 = vmul.u32.u64.high %v2444_v47, %v430_v36, %v2484_v40  ;;  %v2488_v42 = vmul.u32.u64.low %v2444_v47, %v426_v35  ;;  %v2489_v43 = vmul.u32.u64.high %v2444_v47, %v426_v35, %v2488_v42  ;;  %v2492_v46 = vpop.f32.mrb[7].mxu0 }
 0x1a5   :  { %v301_v53 = vor.u32 %v300_v37, %v299_v33  ;;  %v303_v55 = vshrl.u32 %v2349_v62, %v294_v14  ;;  %v295_v59 = vshrl.u32 %v2346_v54, %v294_v14  ;;  %v305_v61 = vshll.u32 %v2349_v62, %v293_v56 }
 0x1a6   :  { %v306_v63 = vshrl.u32 %v2350_v0, %v294_v14  ;;  %v309_v1 = vshrl.u32 %v2351_v9, %v294_v14  ;;  %v438_v3 = vmul.u32 %v2444_v47, %v422_v34  ;;  %v308_v5 = vshll.u32 %v2350_v0, %v293_v56 }
 0x1a7   :  { %v304_v4 = vor.u32 %v303_v55, %v302_v45  ;;  %vm311_vm7 = vcmp.lt.s32.totalorder %v2446_v49, 1  ;;  %vm440_vm8 = vc.u32 %v2485_v41, %v2488_v42  ;;  %v441_v7 = vadd.s32 1, %v2489_v43 }
 0x1a8   :  { %v307_v8 = vor.u32 %v306_v63, %v305_v61  ;;  %vm312_vm9 = vcmp.lt.s32.totalorder %v2446_v49, 2  ;;  %v310_v10 = vor.u32 %v309_v1, %v308_v5  ;;  %vm313_vm10 = vcmp.lt.s32.totalorder %v2446_v49, 3 }
 0x1a9   :  { %vm314_vm11 = vcmp.lt.s32.totalorder %v2446_v49, 4  ;;  %v319_v11 = vsel %vm311_vm7, %v298_v48, %v301_v53  ;;  %v442_v47 = vsel %vm440_vm8, %v441_v7, %v2489_v43  ;;  %v323_v13 = vsel %vm311_vm7, %v301_v53, %v304_v4 }
 0x1aa   :  { %v316_v12 = vsel %vm314_vm11, %v304_v4, 2102212464  ;;  %v320_v56 = vsel %vm314_vm11, %v307_v8, 920167782  ;;  %v443_v14 = vadd.s32 %v442_v47, %v438_v3  ;;  %v315_v15 = vsel %vm311_vm7, %v295_v59, %v298_v48 }
 0x1ab   :  { %v321_v16 = vsel %vm313_vm10, %v304_v4, %v320_v56  ;;  %v324_v17 = vsel %vm314_vm11, %v310_v10, 1326507024  ;;  %v317_v18 = vsel %vm313_vm10, %v301_v53, %v316_v12  ;;  %v2030_v23 = vadd.s32 4294967169, %v2455_v57  ;;  %v1943_v57 = vld [vmem:[%s3735_s3] sm:$0x1] }
 0x1ac   :  { %v322_v19 = vsel %vm312_vm9, %v319_v11, %v321_v16  ;;  %v325_v21 = vsel %vm313_vm10, %v307_v8, %v324_v17  ;;  %v444_v26 = vadd.s32 536870912, %v443_v14  ;;  %v318_v34 = vsel %vm312_vm9, %v315_v15, %v317_v18 }
 0x1ad   :  { %v326_v28 = vsel %vm312_vm9, %v323_v13, %v325_v21  ;;  %v2516_v29 = vmul.u32.u64.low %v2448_v50, %v322_v19  ;;  %v2517_v30 = vmul.u32.u64.high %v2448_v50, %v322_v19, %v2516_v29  ;;  %v601_v35 = vadd.s32 1, %v2030_v23  ;;  %v2562_v13 = vpop.f32.mrb[0].mxu1 }
 0x1ae   :  { %v2521_v31 = vmul.u32.u64.low %v2448_v50, %v326_v28  ;;  %v2522_v32 = vmul.u32.u64.high %v2448_v50, %v326_v28, %v2521_v31  ;;  %v445_v33 = vshrl.u32 %v444_v26, 30  ;;  %v2530_v36 = vshrl.u32 %v1946_v44, 7 }
 0x1af   :  { %v598_v37 = vand.u32 8388607, %v591_v51  ;;  %v337_v43 = vadd.s32 1, %v2517_v30  ;;  %vm602_vm12 = vcmp.gt.s32.totalorder %v601_v35, 0  ;;  %v490_v48 = vand.u32 2139095040, %v2452_v52 }
 0x1b0   :  { %v446_v40 = vshll.u32 %v445_v33, 30  ;;  %v469_v53 = vsub.s32 4, %v445_v33  ;;  %v334_v49 = vmul.u32 %v2448_v50, %v318_v34  ;;  %vm336_vm13 = vc.u32 %v2522_v32, %v2516_v29 }
 0x1b1   :  { %v603_v45 = vsel %vm602_vm12, %v601_v35, 0  ;;  %vm1944_vm14 = vcmp.ne.s32.totalorder %v1943_v57, 0  ;;  %v338_v44 = vsel %vm336_vm13, %v337_v43, %v2517_v30  ;;  %v599_v61 = vor.u32 8388608, %v598_v37 }
 0x1b2   :  { %v2539_v55 = vsub.s32 %v443_v14, %v446_v40  ;;  %v339_v59 = vadd.s32 %v338_v44, %v334_v49  ;;  %v605_v63 = vand.u32 31, %v603_v45  ;;  %v487_v1 = vand.u32 2147483647, %v2452_v52 }
 0x1b3   :  { %v491_v4 = vshrl.u32 %v490_v48, 23  ;;  %v2547_v50 = vsel %vm385_vm15, %v469_v53, %v445_v33  ;;  %v2549_v7 = vshrl.u32 %v603_v45, 5  ;;  %v2352_v47 = vmov 0  }
 0x1b4   :  { %v449_v3 = vsub.s32 0, %v2539_v55  ;;  %v340_v5 = vadd.s32 536870912, %v339_v59  ;;  %v606_v8 = vsub.s32 32, %v605_v63  ;;  %v2559_v12 = vsel %vm1944_vm14, 1, %v2352_v47 }
 0x1b5   :  { %v1948_v56 = vsub.s32 0, %v2530_v36  ;;  %v439_v14 = vadd.s32 %v2488_v42, %v2485_v41  ;;  %v2567_v25 = vshll.u32 %v599_v61, 8  ;;  %v2571_v16 = vand.u32 8388607, %v487_v1 }
 0x1b6   :  { %v2023_v11 = vmin.u32 %v449_v3, %v2539_v55  ;;  %v341_v15 = vshrl.u32 %v340_v5, 30  ;;  %v472_v18 = vsel %vm2553_vm0, 0, %v2547_v50  ;;  %v609_v19 = vshrl.u32 %v2347_v58, %v606_v8 }
 0x1b7   :  { %v2577_v21 = vadd.s32 4294967169, %v491_v4  ;;  %v608_v41 = vshll.u32 %v2346_v54, %v605_v63  ;;  %v612_v42 = vshrl.u32 %v2348_v60, %v606_v8  ;;  %vm623_vm2 = vcmp.lt.s32.totalorder %v2549_v7, 1 }
 0x1b8   :  { %v451_v17 = vclz %v2023_v11  ;;  %v342_v23 = vshll.u32 %v341_v15, 30  ;;  %v614_v28 = vshll.u32 %v2348_v60, %v605_v63  ;;  %v615_v30 = vshrl.u32 %v2349_v62, %v606_v8 }
 0x1b9   :  { %v618_v31 = vshrl.u32 %v2350_v0, %v606_v8  ;;  %v611_v34 = vshll.u32 %v2347_v58, %v605_v63  ;;  %v617_v35 = vshll.u32 %v2349_v62, %v605_v63  ;;  %v621_v57 = vshrl.u32 %v2351_v9, %v606_v8 }
 0x1ba   :  { %v2024_v26 = vadd.s32 4294967294, %v451_v17  ;;  %v2585_v33 = vsub.s32 %v339_v59, %v342_v23  ;;  %vm624_vm3 = vcmp.lt.s32.totalorder %v2549_v7, 2  ;;  %v365_v37 = vsub.s32 4, %v341_v15 }
 0x1bb   :  { %v610_v40 = vor.u32 %v609_v19, %v608_v41  ;;  %v616_v43 = vor.u32 %v615_v30, %v614_v28  ;;  %v613_v49 = vor.u32 %v612_v42, %v611_v34  ;;  %v620_v45 = vshll.u32 %v2350_v0, %v605_v63 }
 0x1bc   :  { %vm2025_vm4 = vcmp.lt.s32.totalorder %v2024_v26, 0  ;;  %v345_v53 = vsub.s32 0, %v2585_v33  ;;  %v619_v61 = vor.u32 %v618_v31, %v617_v35  ;;  %vm626_vm5 = vcmp.lt.s32.totalorder %v2549_v7, 4 }
 0x1bd   :  { %v454_v48 = vsel %vm2025_vm4, 0, %v2024_v26  ;;  %vm2596_vm6 = vcmp.le.f32.partialorder %v279_v27, 0.7853982  ;;  %v607_v5 = vshrl.u32 %v2346_v54, %v606_v8  ;;  %v622_v11 = vor.u32 %v621_v57, %v620_v45 }
 0x1be   :  { %v455_v44 = vsub.s32 32, %v454_v48  ;;  %v459_v59 = vsub.s32 4294967266, %v454_v48  ;;  %v2019_v4 = vmin.u32 %v345_v53, %v2585_v33  ;;  %v628_v47 = vsel %vm626_vm5, %v616_v43, 2102212464 }
 0x1bf   :  { %v456_v63 = vshll.u32 %v2539_v55, %v454_v48  ;;  %v366_v23 = vsel %vm281_vm1, %v365_v37, %v341_v15  ;;  %vm625_vm7 = vcmp.lt.s32.totalorder %v2549_v7, 3  ;;  %v627_v27 = vsel %vm623_vm2, %v607_v5, %v610_v40 }
 0x1c0   :  { %v457_v17 = vshrl.u32 %v439_v14, %v455_v44  ;;  %v460_v19 = vadd.s32 127, %v459_v59  ;;  %v347_v41 = vclz %v2019_v4  ;;  %v631_v8 = vsel %vm623_vm2, %v610_v40, %v613_v49  ;;  %v2631_v59 = vpop.f32.mrb[1].mxu1 }
 0x1c1   :  { %v629_v28 = vsel %vm625_vm7, %v613_v49, %v628_v47  ;;  %v632_v55 = vsel %vm626_vm5, %v619_v61, 920167782  ;;  %v635_v15 = vsel %vm623_vm2, %v613_v49, %v616_v43  ;;  %v636_v31 = vsel %vm626_vm5, %v622_v11, 1326507024 }
 0x1c2   :  { %v458_v42 = vor.u32 %v457_v17, %v456_v63  ;;  %v461_v26 = vshll.u32 %v460_v19, 23  ;;  %v2020_v14 = vadd.s32 4294967294, %v347_v41  ;;  %v633_v30 = vsel %vm625_vm7, %v616_v43, %v632_v55 }
 0x1c3   :  { %v634_v57 = vsel %vm624_vm3, %v631_v8, %v633_v30  ;;  %v637_v37 = vsel %vm625_vm7, %v619_v61, %v636_v31  ;;  %v335_v61 = vadd.s32 %v2516_v29, %v2522_v32  ;;  %v630_v11 = vsel %vm624_vm3, %v627_v27, %v629_v28 }
 0x1c4   :  { %v462_v34 = vor.u32 4788187, %v461_v26  ;;  %v465_v35 = vcvt.s32.f32 %v458_v42  ;;  %vm2021_vm8 = vcmp.lt.s32.totalorder %v2020_v14, 0  ;;  %v638_v40 = vsel %vm624_vm3, %v635_v15, %v637_v37 }
 0x1c5   :  { %v2623_v48 = vmul.u32.u64.low %v2567_v25, %v634_v57  ;;  %v2624_v53 = vmul.u32.u64.high %v2567_v25, %v634_v57, %v2623_v48  ;;  %v350_v43 = vsel %vm2021_vm8, 0, %v2020_v14  ;;  %v476_v63 = vadd.s32 3, %v472_v18 }
 0x1c6   :  { %v463_v45 = vand.u32 2147483647, %v462_v34  ;;  %v2628_v49 = vmul.u32.u64.low %v2567_v25, %v638_v40  ;;  %v2629_v44 = vmul.u32.u64.high %v2567_v25, %v638_v40, %v2628_v49  ;;  %v351_v4 = vsub.s32 32, %v350_v43 }
 0x1c7   :  { %v355_v5 = vsub.s32 4294967266, %v350_v43  ;;  %v368_v17 = vsel %vm2596_vm6, 0, %v366_v23  ;;  %v497_v19 = vadd.s32 1, %v2577_v21  ;;  %v352_v41 = vshll.u32 %v2585_v33, %v350_v43 }
 0x1c8   :  { %v466_v47 = vmul.f32 %v465_v35, %v463_v45  ;;  %v353_v8 = vshrl.u32 %v335_v61, %v351_v4  ;;  %v649_v32 = vadd.s32 1, %v2624_v53  ;;  %v646_v7 = vmul.u32 %v2567_v25, %v630_v11 }
 0x1c9   :  { %v356_v29 = vadd.s32 127, %v355_v5  ;;  %vm648_vm9 = vc.u32 %v2629_v44, %v2623_v48  ;;  %vm498_vm10 = vcmp.gt.s32.totalorder %v497_v19, 0  ;;  %v372_v33 = vadd.s32 3, %v368_v17 }
 0x1ca   :  { %v467_v42 = vxor.u32 2147483648, %v466_v47  ;;  %v354_v50 = vor.u32 %v353_v8, %v352_v41  ;;  %v650_v27 = vsel %vm648_vm9, %v649_v32, %v2624_v53  ;;  %v499_v23 = vsel %vm498_vm10, %v497_v19, 0 }
 0x1cb   :  { %v357_v18 = vshll.u32 %v356_v29, 23  ;;  %v651_v26 = vadd.s32 %v650_v27, %v646_v7  ;;  %v501_v28 = vand.u32 31, %v499_v23  ;;  %v2655_v14 = vand.u32 3, %v476_v63 }
 0x1cc   :  { %v468_v21 = vsel %vm385_vm15, %v467_v42, %v466_v47  ;;  %v2660_v31 = vrot.slane %v2559_v12, %v1948_v56  ;;  %v361_v35 = vcvt.s32.f32 %v354_v50  ;;  %v2662_v57 = vand.u32 3, %v372_v33 }
 0x1cd   :  { %v471_v55 = vsel %vm2553_vm0, %v2427_v22, %v468_v21  ;;  %v358_v25 = vor.u32 4788187, %v357_v18  ;;  %v652_v30 = vadd.s32 536870912, %v651_v26  ;;  %v502_v15 = vsub.s32 32, %v501_v28 }
 0x1ce   :  { %2206 = vcosq.f32 %v471_v55  ;;  %v495_v10 = vor.u32 8388608, %v2571_v16  ;;  %vm482_vm11 = vcmp.eq.s32.totalorder %v2655_v14, 2  ;;  %v2673_v56 = vshrl.u32 %v499_v23, 5 }
 0x1cf   :  { %2208 = vsinq.f32 %v471_v55  ;;  %v359_v34 = vand.u32 2147483647, %v358_v25  ;;  %v2664_v37 = vshrl.u32 %v652_v30, 30  ;;  %v505_v40 = vshrl.u32 %v2347_v58, %v502_v15 }
 0x1d0   :  { %v508_v45 = vshrl.u32 %v2348_v60, %v502_v15  ;;  %v511_v43 = vshrl.u32 %v2349_v62, %v502_v15  ;;  %v514_v36 = vshrl.u32 %v2350_v0, %v502_v15  ;;  %v510_v49 = vshll.u32 %v2348_v60, %v501_v28 }
 0x1d1   :  { %v362_v53 = vmul.f32 %v361_v35, %v359_v34  ;;  %v654_v12 = vshll.u32 %v2664_v37, 30  ;;  %v2678_v16 = vadd.f32 %v2461_v2, %v2424_v20  ;;  %vm479_vm12 = vcmp.eq.s32.totalorder %v2655_v14, 0 }
 0x1d2   :  { %v504_v4 = vshll.u32 %v2346_v54, %v501_v28  ;;  %v507_v5 = vshll.u32 %v2347_v58, %v501_v28  ;;  %v513_v11 = vshll.u32 %v2349_v62, %v501_v28  ;;  %vm478_vm13 = vcmp.lt.s32.totalorder %v2655_v14, 2 }
 0x1d3   :  { %v363_v61 = vxor.u32 2147483648, %v362_v53  ;;  %vm1950_vm14 = vcmp.eq.s32.totalorder %v2660_v31, 1  ;;  %v2686_v47 = vsub.s32 %v651_v26, %v654_v12  ;;  %v512_v63 = vor.u32 %v511_v43, %v510_v49 }
 0x1d4   :  { %v517_v17 = vshrl.u32 %v2351_v9, %v502_v15  ;;  %v2689_v2 = vshll.u32 %v495_v10, 8  ;;  %vm475_vm15 = vweird.f32 %v2427_v22  ;;  %vm593_vm0 = vcmp.lt.s32.totalorder %v2441_v38, 0 }
 0x1d5   :  { %v364_v19 = vsel %vm281_vm1, %v363_v61, %v362_v53  ;;  %v506_v41 = vor.u32 %v505_v40, %v504_v4  ;;  %v509_v8 = vor.u32 %v508_v45, %v507_v5  ;;  %v515_v29 = vor.u32 %v514_v36, %v513_v11 }
 0x1d6   :  { %v367_v32 = vsel %vm2596_vm6, %v2430_v24, %v364_v19  ;;  %v657_v42 = vsub.s32 0, %v2686_v47  ;;  %v503_v7 = vshrl.u32 %v2346_v54, %v502_v15  ;;  %v516_v50 = vshll.u32 %v2350_v0, %v501_v28 }
 0x1d7   :  { %2210 = vcosq.f32 %v367_v32  ;;  %v677_v18 = vsub.s32 4, %v2664_v37  ;;  %vm519_vm1 = vcmp.lt.s32.totalorder %v2673_v56, 1  ;;  %vm522_vm2 = vcmp.lt.s32.totalorder %v2673_v56, 4 }
 0x1d8   :  { %v2207_v27 = vpop.eup %2206  ;;  %2212 = vsinq.f32 %v367_v32  ;;  %vm2706_vm3 = vcmp.le.f32.partialorder %v591_v51, 0.7853982  ;;  %v2031_v23 = vmin.u32 %v657_v42, %v2686_v47  ;;  %v518_v21 = vor.u32 %v517_v17, %v516_v50 }
 0x1d9   :  { %v524_v33 = vsel %vm522_vm2, %v512_v63, 2102212464  ;;  %v2209_v26 = vpop.eup %2208  ;;  %v483_v28 = vxor.u32 2147483648, %v2207_v27  ;;  %vm520_vm4 = vcmp.lt.s32.totalorder %v2673_v56, 2  ;;  %v527_v55 = vsel %vm519_vm1, %v506_v41, %v509_v8 }
 0x1da   :  { %v528_v25 = vsel %vm522_vm2, %v515_v29, 920167782  ;;  %v480_v51 = vxor.u32 2147483648, %v2209_v26  ;;  %v659_v30 = vclz %v2031_v23  ;;  %vm521_vm5 = vcmp.lt.s32.totalorder %v2673_v56, 3 }
 0x1db   :  { %v523_v15 = vsel %vm519_vm1, %v503_v7, %v506_v41  ;;  %v484_v34 = vsel %vm482_vm11, %v483_v28, %v2209_v26  ;;  %v525_v35 = vsel %vm521_vm5, %v509_v8, %v524_v33  ;;  %v529_v10 = vsel %vm521_vm5, %v512_v63, %v528_v25 }
 0x1dc   :  { %v531_v40 = vsel %vm519_vm1, %v509_v8, %v512_v63  ;;  %v481_v53 = vsel %vm479_vm12, %v2207_v27, %v480_v51  ;;  %vm375_vm6 = vcmp.eq.s32.totalorder %v2662_v57, 0  ;;  %v2032_v45 = vadd.s32 4294967294, %v659_v30 }
 0x1dd   :  { %v530_v43 = vsel %vm520_vm4, %v527_v55, %v529_v10  ;;  %v532_v36 = vsel %vm522_vm2, %v518_v21, 1326507024  ;;  %v485_v12 = vsel %vm478_vm13, %v481_v53, %v484_v34  ;;  %vm374_vm7 = vcmp.lt.s32.totalorder %v2662_v57, 2 }
 0x1de   :  { %v533_v49 = vsel %vm521_vm5, %v515_v29, %v532_v36  ;;  %v2736_v61 = vmul.u32.u64.low %v2689_v2, %v530_v43  ;;  %v2737_v4 = vmul.u32.u64.high %v2689_v2, %v530_v43, %v2736_v61  ;;  %v486_v5 = vsel %vm475_vm15, nan, %v485_v12 }
 0x1df   :  { %vm2033_vm8 = vcmp.lt.s32.totalorder %v2032_v45, 0  ;;  %v678_v11 = vsel %vm593_vm0, %v677_v18, %v2664_v37  ;;  %v534_v63 = vsel %vm520_vm4, %v531_v40, %v533_v49  ;;  %v1952_v14 = vsel %vm1950_vm14, %v2427_v22, %v486_v5 }
 0x1e0   :  { %v662_v17 = vsel %vm2033_vm8, 0, %v2032_v45  ;;  %v2750_v19 = vmul.u32.u64.low %v2689_v2, %v534_v63  ;;  %v2751_v41 = vmul.u32.u64.high %v2689_v2, %v534_v63, %v2750_v19  ;;  %1968 = vst [vmem:[#allocation7 + $0x8] sm:$0xff] %v1952_v14  ;;  %v647_v8 = vadd.s32 %v2623_v48, %v2629_v44 }
 0x1e1   :  { %v663_v29 = vsub.s32 32, %v662_v17  ;;  %v667_v32 = vsub.s32 4294967266, %v662_v17  ;;  %v526_v37 = vsel %vm520_vm4, %v523_v15, %v525_v35  ;;  %v2211_v42 = vpop.eup %2210  ;;  %vm378_vm9 = vcmp.eq.s32.totalorder %v2662_v57, 2 }
 0x1e2   :  { %v680_v22 = vsel %vm2706_vm3, 0, %v678_v11  ;;  %v545_v7 = vadd.s32 1, %v2737_v4  ;;  %v802_v50 = vand.u32 2139095040, %v2678_v16  ;;  %v2213_v18 = vpop.eup %2212  ;;  %v379_v27 = vxor.u32 2147483648, %v2211_v42  ;;  %v2781_v11 = vpop.f32.mrb[2].mxu1 }
 0x1e3   :  { %v664_v23 = vshll.u32 %v2686_v47, %v662_v17  ;;  %v665_v48 = vshrl.u32 %v647_v8, %v663_v29  ;;  %v668_v44 = vadd.s32 127, %v667_v32  ;;  %v376_v21 = vxor.u32 2147483648, %v2213_v18 }
 0x1e4   :  { %v542_v56 = vmul.u32 %v2689_v2, %v526_v37  ;;  %vm544_vm10 = vc.u32 %v2751_v41, %v2736_v61  ;;  %v803_v33 = vshrl.u32 %v802_v50, 23  ;;  %v380_v26 = vsel %vm378_vm9, %v379_v27, %v2213_v18 }
 0x1e5   :  { %v666_v28 = vor.u32 %v665_v48, %v664_v23  ;;  %v669_v55 = vshll.u32 %v668_v44, 23  ;;  %v546_v25 = vsel %vm544_vm10, %v545_v7, %v2737_v4  ;;  %v377_v51 = vsel %vm375_vm6, %v2211_v42, %v376_v21 }
 0x1e6   :  { %v547_v30 = vadd.s32 %v546_v25, %v542_v56  ;;  %v799_v15 = vand.u32 2147483647, %v2678_v16  ;;  %v2038_v47 = vadd.s32 4294967169, %v803_v33  ;;  %vm371_vm11 = vweird.f32 %v2430_v24 }
 0x1e7   :  { %v381_v2 = vsel %vm374_vm7, %v377_v51, %v380_v26  ;;  %v670_v34 = vor.u32 4788187, %v669_v55  ;;  %v673_v43 = vcvt.s32.f32 %v666_v28  ;;  %v684_v36 = vadd.s32 3, %v680_v22 }
 0x1e8   :  { %v382_v35 = vsel %vm371_vm11, nan, %v381_v2  ;;  %v548_v10 = vadd.s32 536870912, %v547_v30  ;;  %v809_v40 = vadd.s32 1, %v2038_v47  ;;  %v806_v49 = vand.u32 8388607, %v799_v15 }
 0x1e9   :  { %v1951_v53 = vsel %vm1950_vm14, %v2430_v24, %v382_v35  ;;  %v671_v45 = vand.u32 2147483647, %v670_v34  ;;  %v2779_v57 = vadd.f32 %v2424_v20, %v2466_v6  ;;  %v2783_v17 = vand.u32 3, %v684_v36 }
 0x1ea   :  { %1967 = vst [vmem:[#allocation7] sm:$0xff] %v1951_v53  ;;  %v549_v12 = vshrl.u32 %v548_v10, 30  ;;  %vm810_vm12 = vcmp.gt.s32.totalorder %v809_v40, 0  ;;  %vm489_vm13 = vcmp.lt.s32.totalorder %v2452_v52, 0  ;;  %v2787_v19 = vadd.s32 %v2736_v61, %v2751_v41 }
 0x1eb   :  { %v674_v4 = vmul.f32 %v673_v43, %v671_v45  ;;  %v811_v5 = vsel %vm810_vm12, %v809_v40, 0  ;;  %v807_v29 = vor.u32 8388608, %v806_v49  ;;  %v695_v6 = vand.u32 2147483647, %v2779_v57 }
 0x1ec   :  { %v550_v63 = vshll.u32 %v549_v12, 30  ;;  %v813_v14 = vand.u32 31, %v811_v5  ;;  %v573_v42 = vsub.s32 4, %v549_v12  ;;  %v698_v7 = vand.u32 2139095040, %v2779_v57 }
 0x1ed   :  { %v675_v24 = vxor.u32 2147483648, %v674_v4  ;;  %v812_v21 = vshrl.u32 %v811_v5, 5  ;;  %v2812_v51 = vshll.u32 %v807_v29, 8  ;;  %vm690_vm15 = vcmp.eq.s32.totalorder %v2783_v17, 2 }
 0x1ee   :  { %v2789_v8 = vsub.s32 %v547_v30, %v550_v63  ;;  %v814_v32 = vsub.s32 32, %v813_v14  ;;  %v816_v22 = vshll.u32 %v2346_v54, %v813_v14  ;;  %v819_v41 = vshll.u32 %v2347_v58, %v813_v14 }
 0x1ef   :  { %v676_v37 = vsel %vm593_vm0, %v675_v24, %v674_v4  ;;  %v822_v18 = vshll.u32 %v2348_v60, %v813_v14  ;;  %v825_v3 = vshll.u32 %v2349_v62, %v813_v14  ;;  %v2810_v25 = vsel %vm489_vm13, %v573_v42, %v549_v12 }
 0x1f0   :  { %v679_v50 = vsel %vm2706_vm3, %v2441_v38, %v676_v37  ;;  %v553_v61 = vsub.s32 0, %v2789_v8  ;;  %v817_v27 = vshrl.u32 %v2347_v58, %v814_v32  ;;  %v820_v23 = vshrl.u32 %v2348_v60, %v814_v32 }
 0x1f1   :  { %2214 = vcosq.f32 %v679_v50  ;;  %v823_v48 = vshrl.u32 %v2349_v62, %v814_v32  ;;  %v826_v28 = vshrl.u32 %v2350_v0, %v814_v32  ;;  %v699_v30 = vshrl.u32 %v698_v7, 23 }
 0x1f2   :  { %2216 = vsinq.f32 %v679_v50  ;;  %v2027_v44 = vmin.u32 %v553_v61, %v2789_v8  ;;  %v818_v56 = vor.u32 %v817_v27, %v816_v22  ;;  %v821_v33 = vor.u32 %v820_v23, %v819_v41 }
 0x1f3   :  { %v824_v26 = vor.u32 %v823_v48, %v822_v18  ;;  %v815_v47 = vshrl.u32 %v2346_v54, %v814_v32  ;;  %v827_v2 = vor.u32 %v826_v28, %v825_v3  ;;  %v828_v34 = vshll.u32 %v2350_v0, %v813_v14  ;;  %v2842_v48 = vpop.f32.mrb[3].mxu1 }
 0x1f4   :  { %v555_v55 = vclz %v2027_v44  ;;  %v829_v35 = vshrl.u32 %v2351_v9, %v814_v32  ;;  %vm831_vm0 = vcmp.lt.s32.totalorder %v812_v21, 1  ;;  %vm833_vm1 = vcmp.lt.s32.totalorder %v812_v21, 3 }
 0x1f5   :  { %vm834_vm2 = vcmp.lt.s32.totalorder %v812_v21, 4  ;;  %vm686_vm3 = vcmp.lt.s32.totalorder %v2783_v17, 2  ;;  %vm2821_vm4 = vcmp.le.f32.partialorder %v487_v1, 0.7853982  ;;  %v835_v45 = vsel %vm831_vm0, %v815_v47, %v818_v56 }
 0x1f6   :  { %v2028_v10 = vadd.s32 4294967294, %v555_v55  ;;  %v830_v53 = vor.u32 %v829_v35, %v828_v34  ;;  %v836_v43 = vsel %vm834_vm2, %v824_v26, 2102212464  ;;  %v839_v36 = vsel %vm831_vm0, %v818_v56, %v821_v33 }
 0x1f7   :  { %vm683_vm5 = vweird.f32 %v2441_v38  ;;  %vm832_vm7 = vcmp.lt.s32.totalorder %v812_v21, 2  ;;  %v837_v12 = vsel %vm833_vm1, %v821_v33, %v836_v43  ;;  %v840_v49 = vsel %vm834_vm2, %v827_v2, 920167782 }
 0x1f8   :  { %vm2029_vm6 = vcmp.lt.s32.totalorder %v2028_v10, 0  ;;  %v841_v5 = vsel %vm833_vm1, %v824_v26, %v840_v49  ;;  %v843_v1 = vsel %vm831_vm0, %v821_v33, %v824_v26  ;;  %v844_v63 = vsel %vm834_vm2, %v830_v53, 1326507024 }
 0x1f9   :  { %v558_v4 = vsel %vm2029_vm6, 0, %v2028_v10  ;;  %v838_v29 = vsel %vm832_vm7, %v835_v45, %v837_v12  ;;  %v842_v32 = vsel %vm832_vm7, %v839_v36, %v841_v5  ;;  %v845_v22 = vsel %vm833_vm1, %v827_v2, %v844_v63 }
 0x1fa   :  { %v559_v14 = vsub.s32 32, %v558_v4  ;;  %v563_v24 = vsub.s32 4294967266, %v558_v4  ;;  %v560_v42 = vshll.u32 %v2789_v8, %v558_v4  ;;  %v846_v23 = vsel %vm832_vm7, %v843_v1, %v845_v22 }
 0x1fb   :  { %v2215_v37 = vpop.eup %2214  ;;  %v2836_v7 = vmul.u32.u64.low %v2812_v51, %v842_v32  ;;  %v2837_v50 = vmul.u32.u64.high %v2812_v51, %v842_v32, %v2836_v7  ;;  %v2845_v3 = vmul.u32.u64.low %v2812_v51, %v846_v23  ;;  %v2846_v8 = vmul.u32.u64.high %v2812_v51, %v846_v23, %v2845_v3 }
 0x1fc   :  { %v2217_v61 = vpop.eup %2216  ;;  %v691_v41 = vxor.u32 2147483648, %v2215_v37  ;;  %v561_v18 = vshrl.u32 %v2787_v19, %v559_v14  ;;  %v564_v27 = vadd.s32 127, %v563_v24  ;;  %v2034_v56 = vadd.s32 4294967169, %v699_v30 }
 0x1fd   :  { %v688_v44 = vxor.u32 2147483648, %v2217_v61  ;;  %vm687_vm8 = vcmp.eq.s32.totalorder %v2783_v17, 0  ;;  %v857_v19 = vadd.s32 1, %v2837_v50  ;;  %v702_v21 = vand.u32 8388607, %v695_v6 }
 0x1fe   :  { %v692_v33 = vsel %vm690_vm15, %v691_v41, %v2217_v61  ;;  %v562_v26 = vor.u32 %v561_v18, %v560_v42  ;;  %v565_v28 = vshll.u32 %v564_v27, 23  ;;  %v705_v47 = vadd.s32 1, %v2034_v56 }
 0x1ff   :  { %v689_v55 = vsel %vm687_vm8, %v2215_v37, %v688_v44  ;;  %v576_v30 = vsel %vm2821_vm4, 0, %v2810_v25  ;;  %v854_v35 = vmul.u32 %v2812_v51, %v838_v29  ;;  %vm856_vm9 = vc.u32 %v2846_v8, %v2836_v7 }
 0x200   :  { %v693_v2 = vsel %vm686_vm3, %v689_v55, %v692_v33  ;;  %v566_v34 = vor.u32 4788187, %v565_v28  ;;  %v569_v53 = vcvt.s32.f32 %v562_v26  ;;  %vm706_vm10 = vcmp.gt.s32.totalorder %v705_v47, 0 }
 0x201   :  { %v694_v10 = vsel %vm683_vm5, nan, %v693_v2  ;;  %v858_v43 = vsel %vm856_vm9, %v857_v19, %v2837_v50  ;;  %v707_v36 = vsel %vm706_vm10, %v705_v47, 0  ;;  %v703_v49 = vor.u32 8388608, %v702_v21 }
 0x202   :  { %v1954_v17 = vsel %vm1950_vm14, %v2441_v38, %v694_v10  ;;  %v567_v45 = vand.u32 2147483647, %v566_v34  ;;  %v859_v25 = vadd.s32 %v858_v43, %v854_v35  ;;  %v709_v12 = vand.u32 31, %v707_v36 }
 0x203   :  { %1970 = vst [vmem:[#allocation7 + $0x18] sm:$0xff] %v1954_v17  ;;  %v2870_v4 = vadd.f32 %v2481_v39, %v2424_v20  ;;  %v580_v5 = vadd.s32 3, %v576_v30  ;;  %v2872_v63 = vshrl.u32 %v707_v36, 5  ;;  %vm801_vm11 = vcmp.lt.s32.totalorder %v2678_v16, 0 }
 0x204   :  { %v570_v51 = vmul.f32 %v569_v53, %v567_v45  ;;  %v860_v1 = vadd.s32 536870912, %v859_v25  ;;  %v710_v14 = vsub.s32 32, %v709_v12  ;;  %v712_v38 = vshll.u32 %v2346_v54, %v709_v12 }
 0x205   :  { %v715_v29 = vshll.u32 %v2347_v58, %v709_v12  ;;  %v718_v32 = vshll.u32 %v2348_v60, %v709_v12  ;;  %v721_v20 = vshll.u32 %v2349_v62, %v709_v12  ;;  %v724_v44 = vshll.u32 %v2350_v0, %v709_v12 }
 0x206   :  { %v571_v24 = vxor.u32 2147483648, %v570_v51  ;;  %v2877_v37 = vshrl.u32 %v860_v1, 30  ;;  %v713_v42 = vshrl.u32 %v2347_v58, %v710_v14  ;;  %v716_v22 = vshrl.u32 %v2348_v60, %v710_v14 }
 0x207   :  { %v719_v50 = vshrl.u32 %v2349_v62, %v710_v14  ;;  %v722_v61 = vshrl.u32 %v2350_v0, %v710_v14  ;;  %v725_v41 = vshrl.u32 %v2351_v9, %v710_v14  ;;  %v581_v26 = vand.u32 3, %v580_v5 }
 0x208   :  { %v572_v39 = vsel %vm489_vm13, %v571_v24, %v570_v51  ;;  %v862_v27 = vshll.u32 %v2877_v37, 30  ;;  %v714_v23 = vor.u32 %v713_v42, %v712_v38  ;;  %v717_v3 = vor.u32 %v716_v22, %v715_v29 }
 0x209   :  { %v575_v18 = vsel %vm2821_vm4, %v2452_v52, %v572_v39  ;;  %v720_v56 = vor.u32 %v719_v50, %v718_v32  ;;  %v723_v33 = vor.u32 %v722_v61, %v721_v20  ;;  %v726_v55 = vor.u32 %v725_v41, %v724_v44 }
 0x20a   :  { %2218 = vcosq.f32 %v575_v18  ;;  %v2892_v28 = vsub.s32 %v859_v25, %v862_v27  ;;  %v1010_v19 = vand.u32 2139095040, %v2870_v4  ;;  %vm727_vm12 = vcmp.lt.s32.totalorder %v2872_v63, 1 }
 0x20b   :  { %2220 = vsinq.f32 %v575_v18  ;;  %vm730_vm13 = vcmp.lt.s32.totalorder %v2872_v63, 4  ;;  %v743_v21 = vshll.u32 %v703_v49, 8  ;;  %vm729_vm15 = vcmp.lt.s32.totalorder %v2872_v63, 3 }
 0x20c   :  { %v865_v40 = vsub.s32 0, %v2892_v28  ;;  %v732_v47 = vsel %vm730_vm13, %v720_v56, 2102212464  ;;  %v735_v2 = vsel %vm727_vm12, %v714_v23, %v717_v3  ;;  %v736_v34 = vsel %vm730_vm13, %v723_v33, 920167782 }
 0x20d   :  { %vm583_vm0 = vcmp.eq.s32.totalorder %v581_v26, 0  ;;  %v711_v35 = vshrl.u32 %v2346_v54, %v710_v14  ;;  %vm728_vm1 = vcmp.lt.s32.totalorder %v2872_v63, 2  ;;  %v737_v10 = vsel %vm729_vm15, %v720_v56, %v736_v34 }
 0x20e   :  { %v2039_v30 = vmin.u32 %v865_v40, %v2892_v28  ;;  %vm582_vm2 = vcmp.lt.s32.totalorder %v581_v26, 2  ;;  %v738_v53 = vsel %vm728_vm1, %v735_v2, %v737_v10  ;;  %v739_v17 = vsel %vm727_vm12, %v717_v3, %v720_v56 }
 0x20f   :  { %v740_v45 = vsel %vm730_vm13, %v726_v55, 1326507024  ;;  %v1011_v43 = vshrl.u32 %v1010_v19, 23  ;;  %vm579_vm3 = vweird.f32 %v2452_v52  ;;  %vm2914_vm4 = vcmp.le.f32.partialorder %v799_v15, 0.7853982 }
 0x210   :  { %v867_v25 = vclz %v2039_v30  ;;  %v731_v12 = vsel %vm727_vm12, %v711_v35, %v714_v23  ;;  %v733_v51 = vsel %vm729_vm15, %v717_v3, %v732_v47  ;;  %v1007_v49 = vand.u32 2147483647, %v2870_v4 }
 0x211   :  { %v885_v5 = vsub.s32 4, %v2877_v37  ;;  %v741_v1 = vsel %vm729_vm15, %v723_v33, %v740_v45  ;;  %v2926_v14 = vmul.u32.u64.low %v743_v21, %v738_v53  ;;  %v2927_v24 = vmul.u32.u64.high %v743_v21, %v738_v53, %v2926_v14 }
 0x212   :  { %vm586_vm5 = vcmp.eq.s32.totalorder %v581_v26, 2  ;;  %v2040_v15 = vadd.s32 4294967294, %v867_v25  ;;  %v742_v38 = vsel %vm728_vm1, %v739_v17, %v741_v1  ;;  %v2046_v29 = vadd.s32 4294967169, %v1011_v43 }
 0x213   :  { %v855_v42 = vadd.s32 %v2836_v7, %v2846_v8  ;;  %v734_v22 = vsel %vm728_vm1, %v731_v12, %v733_v51  ;;  %v2936_v20 = vmul.u32.u64.low %v743_v21, %v742_v38  ;;  %v2937_v39 = vmul.u32.u64.high %v743_v21, %v742_v38, %v2936_v20  ;;  %v2962_v51 = vld [vmem:[%s3734_s2] ss:$0 sm:$0xff] }
 0x214   :  { %v2219_v32 = vpop.eup %2218  ;;  %vm2041_vm6 = vcmp.lt.s32.totalorder %v2040_v15, 0  ;;  %v1014_v41 = vand.u32 8388607, %v1007_v49  ;;  %v1017_v18 = vadd.s32 1, %v2046_v29  ;;  %v886_v44 = vsel %vm801_vm11, %v885_v5, %v2877_v37 }
 0x215   :  { %v2221_v50 = vpop.eup %2220  ;;  %v587_v61 = vxor.u32 2147483648, %v2219_v32  ;;  %v870_v23 = vsel %vm2041_vm6, 0, %v2040_v15  ;;  %v753_v7 = vadd.s32 1, %v2927_v24  ;;  %v750_v56 = vmul.u32 %v743_v21, %v734_v22 }
 0x216   :  { %v584_v27 = vxor.u32 2147483648, %v2221_v50  ;;  %v871_v63 = vsub.s32 32, %v870_v23  ;;  %v875_v3 = vsub.s32 4294967266, %v870_v23  ;;  %v872_v55 = vshll.u32 %v2892_v28, %v870_v23 }
 0x217   :  { %v588_v8 = vsel %vm586_vm5, %v587_v61, %v2221_v50  ;;  %vm752_vm7 = vc.u32 %v2937_v39, %v2926_v14  ;;  %vm1018_vm8 = vcmp.gt.s32.totalorder %v1017_v18, 0  ;;  %v888_v21 = vsel %vm2914_vm4, 0, %v886_v44 }
 0x218   :  { %v585_v33 = vsel %vm583_vm0, %v2219_v32, %v584_v27  ;;  %v873_v40 = vshrl.u32 %v855_v42, %v871_v63  ;;  %v876_v47 = vadd.s32 127, %v875_v3  ;;  %v754_v37 = vsel %vm752_vm7, %v753_v7, %v2927_v24 }
 0x219   :  { %v589_v19 = vsel %vm582_vm2, %v585_v33, %v588_v8  ;;  %v755_v34 = vadd.s32 %v754_v37, %v750_v56  ;;  %v1019_v30 = vsel %vm1018_vm8, %v1017_v18, 0  ;;  %v892_v45 = vadd.s32 3, %v888_v21 }
 0x21a   :  { %v590_v2 = vsel %vm579_vm3, nan, %v589_v19  ;;  %v874_v35 = vor.u32 %v873_v40, %v872_v55  ;;  %v877_v10 = vshll.u32 %v876_v47, 23  ;;  %v1021_v53 = vand.u32 31, %v1019_v30  ;;  %v2993_v47 = vpop.f32.mrb[4].mxu1 }
 0x21b   :  { %v1953_v28 = vsel %vm1950_vm14, %v2452_v52, %v590_v2  ;;  %v756_v26 = vadd.s32 536870912, %v755_v34  ;;  %v1015_v25 = vor.u32 8388608, %v1014_v41  ;;  %v2966_v5 = vadd.f32 %v2962_v51, %v2492_v46 }
 0x21c   :  { %1969 = vst [vmem:[#allocation7 + $0x10] sm:$0xff] %v1953_v28  ;;  %v878_v17 = vor.u32 4788187, %v877_v10  ;;  %v1022_v12 = vsub.s32 32, %v1021_v53  ;;  %v881_v1 = vcvt.s32.f32 %v874_v35  ;;  %v2968_v24 = vshrl.u32 %v1019_v30, 5 }
 0x21d   :  { %v757_v43 = vshrl.u32 %v756_v26, 30  ;;  %v1024_v15 = vshll.u32 %v2346_v54, %v1021_v53  ;;  %v1027_v32 = vshll.u32 %v2347_v58, %v1021_v53  ;;  %v1030_v42 = vshll.u32 %v2348_v60, %v1021_v53 }
 0x21e   :  { %v879_v52 = vand.u32 2147483647, %v878_v17  ;;  %v1025_v29 = vshrl.u32 %v2347_v58, %v1022_v12  ;;  %v1028_v20 = vshrl.u32 %v2348_v60, %v1022_v12  ;;  %v1031_v50 = vshrl.u32 %v2349_v62, %v1022_v12 }
 0x21f   :  { %v758_v38 = vshll.u32 %v757_v43, 30  ;;  %v1034_v46 = vshrl.u32 %v2350_v0, %v1022_v12  ;;  %v2977_v61 = vand.u32 3, %v892_v45  ;;  %v1033_v18 = vshll.u32 %v2349_v62, %v1021_v53 }
 0x220   :  { %v882_v22 = vmul.f32 %v881_v1, %v879_v52  ;;  %v1037_v27 = vshrl.u32 %v2351_v9, %v1022_v12  ;;  %vm697_vm9 = vcmp.lt.s32.totalorder %v2779_v57, 0  ;;  %v1026_v44 = vor.u32 %v1025_v29, %v1024_v15 }
 0x221   :  { %v2979_v41 = vsub.s32 %v755_v34, %v758_v38  ;;  %v1029_v7 = vor.u32 %v1028_v20, %v1027_v32  ;;  %v1032_v8 = vor.u32 %v1031_v50, %v1030_v42  ;;  %v1035_v3 = vor.u32 %v1034_v46, %v1033_v18 }
 0x222   :  { %v883_v23 = vxor.u32 2147483648, %v882_v22  ;;  %v1036_v56 = vshll.u32 %v2350_v0, %v1021_v53  ;;  %v2986_v33 = vshll.u32 %v1015_v25, 8  ;;  %v1023_v19 = vshrl.u32 %v2346_v54, %v1022_v12 }
 0x223   :  { %v761_v63 = vsub.s32 0, %v2979_v41  ;;  %vm1039_vm10 = vcmp.lt.s32.totalorder %v2968_v24, 1  ;;  %v906_v40 = vand.u32 2139095040, %v2966_v5  ;;  %vm1042_vm12 = vcmp.lt.s32.totalorder %v2968_v24, 4 }
 0x224   :  { %v884_v55 = vsel %vm801_vm11, %v883_v23, %v882_v22  ;;  %v1038_v21 = vor.u32 %v1037_v27, %v1036_v56  ;;  %vm3002_vm11 = vcmp.le.f32.partialorder %v695_v6, 0.7853982  ;;  %v1044_v30 = vsel %vm1042_vm12, %v1032_v8, 2102212464 }
 0x225   :  { %v887_v37 = vsel %vm2914_vm4, %v2678_v16, %v884_v55  ;;  %v2035_v2 = vmin.u32 %v761_v63, %v2979_v41  ;;  %v1047_v28 = vsel %vm1039_vm10, %v1026_v44, %v1029_v7  ;;  %v1048_v36 = vsel %vm1042_vm12, %v1035_v3, 920167782 }
 0x226   :  { %2222 = vcosq.f32 %v887_v37  ;;  %v781_v10 = vsub.s32 4, %v757_v43  ;;  %vm1041_vm13 = vcmp.lt.s32.totalorder %v2968_v24, 3  ;;  %vm1040_vm15 = vcmp.lt.s32.totalorder %v2968_v24, 2 }
 0x227   :  { %2224 = vsinq.f32 %v887_v37  ;;  %v763_v35 = vclz %v2035_v2  ;;  %v1043_v6 = vsel %vm1039_vm10, %v1023_v19, %v1026_v44  ;;  %v1049_v26 = vsel %vm1041_vm13, %v1032_v8, %v1048_v36 }
 0x228   :  { %v1051_v53 = vsel %vm1039_vm10, %v1029_v7, %v1032_v8  ;;  %v1045_v45 = vsel %vm1041_vm13, %v1029_v7, %v1044_v30  ;;  %v1050_v25 = vsel %vm1040_vm15, %v1047_v28, %v1049_v26  ;;  %v1052_v12 = vsel %vm1042_vm12, %v1038_v21, 1326507024 }
 0x229   :  { %v2036_v17 = vadd.s32 4294967294, %v763_v35  ;;  %v1053_v52 = vsel %vm1041_vm13, %v1035_v3, %v1052_v12  ;;  %v3023_v1 = vmul.u32.u64.low %v2986_v33, %v1050_v25  ;;  %v3024_v15 = vmul.u32.u64.high %v2986_v33, %v1050_v25, %v3023_v1 }
 0x22a   :  { %v907_v38 = vshrl.u32 %v906_v40, 23  ;;  %v782_v29 = vsel %vm697_vm9, %v781_v10, %v757_v43  ;;  %v1054_v32 = vsel %vm1040_vm15, %v1051_v53, %v1053_v52  ;;  %v903_v42 = vand.u32 2147483647, %v2966_v5  ;;  %v3040_v43 = vpop.f32.mrb[5].mxu1 }
 0x22b   :  { %vm2037_vm0 = vcmp.lt.s32.totalorder %v2036_v17, 0  ;;  %v3033_v20 = vmul.u32.u64.low %v2986_v33, %v1054_v32  ;;  %v3034_v50 = vmul.u32.u64.high %v2986_v33, %v1054_v32, %v3033_v20  ;;  %v751_v18 = vadd.s32 %v2926_v14, %v2937_v39 }
 0x22c   :  { %v766_v22 = vsel %vm2037_vm0, 0, %v2036_v17  ;;  %v2042_v46 = vadd.s32 4294967169, %v907_v38  ;;  %v1046_v44 = vsel %vm1040_vm15, %v1043_v6, %v1045_v45  ;;  %vm894_vm1 = vcmp.lt.s32.totalorder %v2977_v61, 2 }
 0x22d   :  { %v767_v27 = vsub.s32 32, %v766_v22  ;;  %v771_v23 = vsub.s32 4294967266, %v766_v22  ;;  %vm895_vm2 = vcmp.eq.s32.totalorder %v2977_v61, 0  ;;  %v1065_v7 = vadd.s32 1, %v3024_v15 }
 0x22e   :  { %v913_v8 = vadd.s32 1, %v2042_v46  ;;  %v768_v63 = vshll.u32 %v2979_v41, %v766_v22  ;;  %v784_v14 = vsel %vm3002_vm11, 0, %v782_v29  ;;  %v1062_v24 = vmul.u32 %v2986_v33, %v1046_v44 }
 0x22f   :  { %v769_v3 = vshrl.u32 %v751_v18, %v767_v27  ;;  %v772_v56 = vadd.s32 127, %v771_v23  ;;  %vm1064_vm3 = vc.u32 %v3034_v50, %v3023_v1  ;;  %v910_v55 = vand.u32 8388607, %v903_v42 }
 0x230   :  { %v2223_v39 = vpop.eup %2222  ;;  %vm914_vm4 = vcmp.gt.s32.totalorder %v913_v8, 0  ;;  %v1066_v41 = vsel %vm1064_vm3, %v1065_v7, %v3024_v15  ;;  %vm898_vm5 = vcmp.eq.s32.totalorder %v2977_v61, 2  ;;  %v788_v35 = vadd.s32 3, %v784_v14 }
 0x231   :  { %v2225_v19 = vpop.eup %2224  ;;  %v899_v40 = vxor.u32 2147483648, %v2223_v39  ;;  %v770_v37 = vor.u32 %v769_v3, %v768_v63  ;;  %v773_v2 = vshll.u32 %v772_v56, 23  ;;  %v1067_v30 = vadd.s32 %v1066_v41, %v1062_v24 }
 0x232   :  { %v896_v21 = vxor.u32 2147483648, %v2225_v19  ;;  %v915_v28 = vsel %vm914_vm4, %v913_v8, 0  ;;  %v3057_v10 = vadd.f32 %v2962_v51, %v2562_v13  ;;  %v911_v53 = vor.u32 8388608, %v910_v55 }
 0x233   :  { %v900_v36 = vsel %vm898_vm5, %v899_v40, %v2225_v19  ;;  %v774_v33 = vor.u32 4788187, %v773_v2  ;;  %v1068_v26 = vadd.s32 536870912, %v1067_v30  ;;  %v917_v17 = vand.u32 31, %v915_v28 }
 0x234   :  { %v897_v6 = vsel %vm895_vm2, %v2223_v39, %v896_v21  ;;  %vm891_vm6 = vweird.f32 %v2678_v16  ;;  %v777_v12 = vcvt.s32.f32 %v770_v37  ;;  %v3069_v32 = vand.u32 3, %v788_v35 }
 0x235   :  { %v901_v45 = vsel %vm894_vm1, %v897_v6, %v900_v36  ;;  %v775_v25 = vand.u32 2147483647, %v774_v33  ;;  %v3064_v15 = vshrl.u32 %v1068_v26, 30  ;;  %v918_v38 = vsub.s32 32, %v917_v17 }
 0x236   :  { %v902_v52 = vsel %vm891_vm6, nan, %v901_v45  ;;  %v1218_v22 = vand.u32 2139095040, %v3057_v10  ;;  %v916_v61 = vshrl.u32 %v915_v28, 5  ;;  %v3074_v18 = vshll.u32 %v911_v53, 8 }
 0x237   :  { %v1956_v13 = vsel %vm1950_vm14, %v2678_v16, %v902_v52  ;;  %v778_v29 = vmul.f32 %v777_v12, %v775_v25  ;;  %v1070_v20 = vshll.u32 %v3064_v15, 30  ;;  %v921_v46 = vshrl.u32 %v2347_v58, %v918_v38 }
 0x238   :  { %1972 = vst [vmem:[#allocation7 + $0x28] sm:$0xff] %v1956_v13  ;;  %v924_v23 = vshrl.u32 %v2348_v60, %v918_v38  ;;  %v926_v44 = vshll.u32 %v2348_v60, %v917_v17  ;;  %v927_v16 = vshrl.u32 %v2349_v62, %v918_v38  ;;  %v920_v8 = vshll.u32 %v2346_v54, %v917_v17 }
 0x239   :  { %v779_v27 = vxor.u32 2147483648, %v778_v29  ;;  %v3079_v7 = vsub.s32 %v1067_v30, %v1070_v20  ;;  %v923_v63 = vshll.u32 %v2347_v58, %v917_v17  ;;  %v930_v3 = vshrl.u32 %v2350_v0, %v918_v38 }
 0x23a   :  { %v928_v14 = vor.u32 %v927_v16, %v926_v44  ;;  %v929_v39 = vshll.u32 %v2349_v62, %v917_v17  ;;  %v1219_v24 = vshrl.u32 %v1218_v22, 23  ;;  %v922_v40 = vor.u32 %v921_v46, %v920_v8 }
 0x23b   :  { %v780_v56 = vsel %vm697_vm9, %v779_v27, %v778_v29  ;;  %v1073_v19 = vsub.s32 0, %v3079_v7  ;;  %v925_v37 = vor.u32 %v924_v23, %v923_v63  ;;  %v932_v41 = vshll.u32 %v2350_v0, %v917_v17 }
 0x23c   :  { %v783_v55 = vsel %vm3002_vm11, %v2779_v57, %v780_v56  ;;  %v931_v2 = vor.u32 %v930_v3, %v929_v39  ;;  %v933_v21 = vshrl.u32 %v2351_v9, %v918_v38  ;;  %vm1009_vm7 = vcmp.lt.s32.totalorder %v2870_v4, 0 }
 0x23d   :  { %2226 = vcosq.f32 %v783_v55  ;;  %v2047_v30 = vmin.u32 %v1073_v19, %v3079_v7  ;;  %v919_v28 = vshrl.u32 %v2346_v54, %v918_v38  ;;  %vm938_vm8 = vcmp.lt.s32.totalorder %v916_v61, 4 }
 0x23e   :  { %2228 = vsinq.f32 %v783_v55  ;;  %v934_v34 = vor.u32 %v933_v21, %v932_v41  ;;  %vm935_vm9 = vcmp.lt.s32.totalorder %v916_v61, 1  ;;  %v940_v36 = vsel %vm938_vm8, %v928_v14, 2102212464 }
 0x23f   :  { %v2054_v33 = vadd.s32 4294967169, %v1219_v24  ;;  %v1075_v35 = vclz %v2047_v30  ;;  %vm937_vm10 = vcmp.lt.s32.totalorder %v916_v61, 3  ;;  %v939_v6 = vsel %vm935_vm9, %v919_v28, %v922_v40  ;;  %v3122_v30 = vpop.f32.mrb[6].mxu1 }
 0x240   :  { %v943_v26 = vsel %vm935_vm9, %v922_v40, %v925_v37  ;;  %v941_v53 = vsel %vm937_vm10, %v925_v37, %v940_v36  ;;  %v944_v17 = vsel %vm938_vm8, %v931_v2, 920167782  ;;  %v947_v45 = vsel %vm935_vm9, %v925_v37, %v928_v14 }
 0x241   :  { %v948_v25 = vsel %vm938_vm8, %v934_v34, 1326507024  ;;  %vm791_vm12 = vcmp.eq.s32.totalorder %v3069_v32, 0  ;;  %v2048_v12 = vadd.s32 4294967294, %v1075_v35  ;;  %vm936_vm11 = vcmp.lt.s32.totalorder %v916_v61, 2 }
 0x242   :  { %v945_v52 = vsel %vm937_vm10, %v928_v14, %v944_v17  ;;  %v949_v13 = vsel %vm937_vm10, %v931_v2, %v948_v25  ;;  %v1093_v38 = vsub.s32 4, %v3064_v15  ;;  %v942_v29 = vsel %vm936_vm11, %v939_v6, %v941_v53 }
 0x243   :  { %v946_v22 = vsel %vm936_vm11, %v943_v26, %v945_v52  ;;  %v950_v20 = vsel %vm936_vm11, %v947_v45, %v949_v13  ;;  %vm787_vm13 = vweird.f32 %v2779_v57  ;;  %vm2049_vm15 = vcmp.lt.s32.totalorder %v2048_v12, 0 }
 0x244   :  { %v3100_v46 = vmul.u32.u64.low %v3074_v18, %v950_v20  ;;  %v3101_v27 = vmul.u32.u64.high %v3074_v18, %v950_v20, %v3100_v46  ;;  %v1225_v23 = vadd.s32 1, %v2054_v33  ;;  %v1078_v44 = vsel %vm2049_vm15, 0, %v2048_v12 }
 0x245   :  { %v3104_v16 = vmul.u32.u64.low %v3074_v18, %v946_v22  ;;  %v3105_v8 = vmul.u32.u64.high %v3074_v18, %v946_v22, %v3104_v16  ;;  %v1215_v61 = vand.u32 2147483647, %v3057_v10  ;;  %v1063_v63 = vadd.s32 %v3023_v1, %v3034_v50 }
 0x246   :  { %v1079_v3 = vsub.s32 32, %v1078_v44  ;;  %v1083_v56 = vsub.s32 4294967266, %v1078_v44  ;;  %vm1226_vm0 = vcmp.gt.s32.totalorder %v1225_v23, 0  ;;  %vm794_vm1 = vcmp.eq.s32.totalorder %v3069_v32, 2 }
 0x247   :  { %v2227_v14 = vpop.eup %2226  ;;  %v1094_v39 = vsel %vm1009_vm7, %v1093_v38, %v3064_v15  ;;  %v958_v24 = vmul.u32 %v3074_v18, %v942_v29  ;;  %v1227_v55 = vsel %vm1226_vm0, %v1225_v23, 0  ;;  %v1080_v37 = vshll.u32 %v3079_v7, %v1078_v44 }
 0x248   :  { %v2229_v19 = vpop.eup %2228  ;;  %v795_v40 = vxor.u32 2147483648, %v2227_v14  ;;  %v1081_v2 = vshrl.u32 %v1063_v63, %v1079_v3  ;;  %v1084_v41 = vadd.s32 127, %v1083_v56  ;;  %vm960_vm2 = vc.u32 %v3101_v27, %v3104_v16 }
 0x249   :  { %v792_v1 = vxor.u32 2147483648, %v2229_v19  ;;  %v961_v50 = vadd.s32 1, %v3105_v8  ;;  %v1222_v21 = vand.u32 8388607, %v1215_v61  ;;  %v1229_v34 = vand.u32 31, %v1227_v55 }
 0x24a   :  { %v796_v15 = vsel %vm794_vm1, %v795_v40, %v2229_v19  ;;  %v1082_v18 = vor.u32 %v1081_v2, %v1080_v37  ;;  %v1085_v28 = vshll.u32 %v1084_v41, 23  ;;  %vm790_vm3 = vcmp.lt.s32.totalorder %v3069_v32, 2 }
 0x24b   :  { %v793_v7 = vsel %vm791_vm12, %v2227_v14, %v792_v1  ;;  %vm3129_vm4 = vcmp.le.f32.partialorder %v1007_v49, 0.7853982  ;;  %v962_v33 = vsel %vm960_vm2, %v961_v50, %v3105_v8  ;;  %v1223_v45 = vor.u32 8388608, %v1222_v21 }
 0x24c   :  { %v797_v35 = vsel %vm790_vm3, %v793_v7, %v796_v15  ;;  %v1086_v6 = vor.u32 4788187, %v1085_v28  ;;  %v1096_v26 = vsel %vm3129_vm4, 0, %v1094_v39  ;;  %v963_v53 = vadd.s32 %v962_v33, %v958_v24 }
 0x24d   :  { %v798_v17 = vsel %vm787_vm13, nan, %v797_v35  ;;  %v1228_v32 = vshrl.u32 %v1227_v55, 5  ;;  %v1230_v25 = vsub.s32 32, %v1229_v34  ;;  %v1089_v52 = vcvt.s32.f32 %v1082_v18 }
 0x24e   :  { %v1955_v49 = vsel %vm1950_vm14, %v2779_v57, %v798_v17  ;;  %v1087_v12 = vand.u32 2147483647, %v1086_v6  ;;  %v964_v13 = vadd.s32 536870912, %v963_v53  ;;  %v1232_v38 = vshll.u32 %v2346_v54, %v1229_v34 }
 0x24f   :  { %1971 = vst [vmem:[#allocation7 + $0x20] sm:$0xff] %v1955_v49  ;;  %v1233_v29 = vshrl.u32 %v2347_v58, %v1230_v25  ;;  %v1236_v22 = vshrl.u32 %v2348_v60, %v1230_v25  ;;  %v1239_v20 = vshrl.u32 %v2349_v62, %v1230_v25  ;;  %v1235_v44 = vshll.u32 %v2347_v58, %v1229_v34 }
 0x250   :  { %v1090_v46 = vmul.f32 %v1089_v52, %v1087_v12  ;;  %v965_v23 = vshrl.u32 %v964_v13, 30  ;;  %v1242_v8 = vshrl.u32 %v2350_v0, %v1230_v25  ;;  %v1100_v63 = vadd.s32 3, %v1096_v26 }
 0x251   :  { %v1238_v57 = vshll.u32 %v2348_v60, %v1229_v34  ;;  %v1241_v3 = vshll.u32 %v2349_v62, %v1229_v34  ;;  %v1234_v39 = vor.u32 %v1233_v29, %v1232_v38  ;;  %v1237_v24 = vor.u32 %v1236_v22, %v1235_v44 }
 0x252   :  { %v1091_v56 = vxor.u32 2147483648, %v1090_v46  ;;  %v966_v14 = vshll.u32 %v965_v23, 30  ;;  %v1244_v40 = vshll.u32 %v2350_v0, %v1229_v34  ;;  %v1245_v37 = vshrl.u32 %v2351_v9, %v1230_v25 }
 0x253   :  { %v1240_v55 = vor.u32 %v1239_v20, %v1238_v57  ;;  %v1243_v19 = vor.u32 %v1242_v8, %v1241_v3  ;;  %vm1247_vm5 = vcmp.lt.s32.totalorder %v1228_v32, 1  ;;  %v1263_v1 = vshll.u32 %v1223_v45, 8 }
 0x254   :  { %v1092_v2 = vsel %vm1009_vm7, %v1091_v56, %v1090_v46  ;;  %v3153_v41 = vsub.s32 %v963_v53, %v966_v14  ;;  %v1231_v21 = vshrl.u32 %v2346_v54, %v1230_v25  ;;  %v1246_v15 = vor.u32 %v1245_v37, %v1244_v40 }
 0x255   :  { %v1095_v50 = vsel %vm3129_vm4, %v2870_v4, %v1092_v2  ;;  %vm1248_vm6 = vcmp.lt.s32.totalorder %v1228_v32, 2  ;;  %vm1249_vm8 = vcmp.lt.s32.totalorder %v1228_v32, 3  ;;  %vm1250_vm9 = vcmp.lt.s32.totalorder %v1228_v32, 4  ;;  %v3197_v2 = vpop.f32.mrb[7].mxu1 }
 0x256   :  { %2230 = vcosq.f32 %v1095_v50  ;;  %v969_v18 = vsub.s32 0, %v3153_v41  ;;  %v1252_v28 = vsel %vm1250_vm9, %v1240_v55, 2102212464  ;;  %v1255_v34 = vsel %vm1247_vm5, %v1234_v39, %v1237_v24 }
 0x257   :  { %2232 = vsinq.f32 %v1095_v50  ;;  %v1256_v7 = vsel %vm1250_vm9, %v1243_v19, 920167782  ;;  %v1259_v36 = vsel %vm1247_vm5, %v1237_v24, %v1240_v55  ;;  %v1260_v6 = vsel %vm1250_vm9, %v1246_v15, 1326507024 }
 0x258   :  { %v2043_v33 = vmin.u32 %v969_v18, %v3153_v41  ;;  %v1257_v35 = vsel %vm1249_vm8, %v1240_v55, %v1256_v7  ;;  %v989_v26 = vsub.s32 4, %v965_v23  ;;  %v1261_v17 = vsel %vm1249_vm8, %v1243_v19, %v1260_v6 }
 0x259   :  { %v1258_v53 = vsel %vm1248_vm6, %v1255_v34, %v1257_v35  ;;  %v3168_v45 = vadd.f32 %v2962_v51, %v2631_v59  ;;  %v1101_v25 = vand.u32 3, %v1100_v63  ;;  %v1251_v12 = vsel %vm1247_vm5, %v1231_v21, %v1234_v39 }
 0x25a   :  { %v971_v49 = vclz %v2043_v33  ;;  %v1253_v52 = vsel %vm1249_vm8, %v1237_v24, %v1252_v28  ;;  %v1262_v13 = vsel %vm1248_vm6, %v1259_v36, %v1261_v17  ;;  %vm905_vm7 = vcmp.lt.s32.totalorder %v2966_v5, 0 }
 0x25b   :  { %v3173_v38 = vmul.u32.u64.low %v1263_v1, %v1258_v53  ;;  %v3174_v29 = vmul.u32.u64.high %v1263_v1, %v1258_v53, %v3173_v38  ;;  %v3177_v20 = vmul.u32.u64.low %v1263_v1, %v1262_v13  ;;  %v3178_v46 = vmul.u32.u64.high %v1263_v1, %v1262_v13, %v3177_v20 }
 0x25c   :  { %v2044_v22 = vadd.s32 4294967294, %v971_v49  ;;  %v990_v59 = vsel %vm905_vm7, %v989_v26, %v965_v23  ;;  %v1254_v44 = vsel %vm1248_vm6, %v1251_v12, %v1253_v52  ;;  %v1114_v8 = vand.u32 2139095040, %v3168_v45 }
 0x25d   :  { %vm1103_vm10 = vcmp.eq.s32.totalorder %v1101_v25, 0  ;;  %vm1106_vm12 = vcmp.eq.s32.totalorder %v1101_v25, 2  ;;  %vm3186_vm11 = vcmp.le.f32.partialorder %v903_v42, 0.7853982  ;;  %v959_v57 = vadd.s32 %v3104_v16, %v3101_v27 }
 0x25e   :  { %vm2045_vm13 = vcmp.lt.s32.totalorder %v2044_v22, 0  ;;  %v1273_v56 = vadd.s32 1, %v3174_v29  ;;  %v1115_v23 = vshrl.u32 %v1114_v8, 23  ;;  %v992_v24 = vsel %vm3186_vm11, 0, %v990_v59 }
 0x25f   :  { %v974_v3 = vsel %vm2045_vm13, 0, %v2044_v22  ;;  %v1270_v55 = vmul.u32 %v1263_v1, %v1254_v44  ;;  %vm1272_vm15 = vc.u32 %v3178_v46, %v3173_v38  ;;  %v1111_v28 = vand.u32 2147483647, %v3168_v45 }
 0x260   :  { %v2231_v32 = vpop.eup %2230  ;;  %v975_v14 = vsub.s32 32, %v974_v3  ;;  %v979_v39 = vsub.s32 4294967266, %v974_v3  ;;  %v976_v40 = vshll.u32 %v3153_v41, %v974_v3  ;;  %v2050_v37 = vadd.s32 4294967169, %v1115_v23 }
 0x261   :  { %v2233_v19 = vpop.eup %2232  ;;  %v1107_v42 = vxor.u32 2147483648, %v2231_v32  ;;  %v1274_v21 = vsel %vm1272_vm15, %v1273_v56, %v3174_v29  ;;  %vm1102_vm0 = vcmp.lt.s32.totalorder %v1101_v25, 2  ;;  %vm1099_vm1 = vweird.f32 %v2870_v4 }
 0x262   :  { %v1104_v27 = vxor.u32 2147483648, %v2233_v19  ;;  %v977_v16 = vshrl.u32 %v959_v57, %v975_v14  ;;  %v980_v50 = vadd.s32 127, %v979_v39  ;;  %v1275_v18 = vadd.s32 %v1274_v21, %v1270_v55 }
 0x263   :  { %v1108_v15 = vsel %vm1106_vm12, %v1107_v42, %v2233_v19  ;;  %v1121_v1 = vadd.s32 1, %v2050_v37  ;;  %v996_v26 = vadd.s32 3, %v992_v24  ;;  %v1118_v25 = vand.u32 8388607, %v1111_v28 }
 0x264   :  { %v1105_v34 = vsel %vm1103_vm10, %v2231_v32, %v1104_v27  ;;  %v978_v41 = vor.u32 %v977_v16, %v976_v40  ;;  %v981_v7 = vshll.u32 %v980_v50, 23  ;;  %v1276_v35 = vadd.s32 536870912, %v1275_v18 }
 0x265   :  { %v1109_v33 = vsel %vm1102_vm0, %v1105_v34, %v1108_v15  ;;  %vm1122_vm2 = vcmp.gt.s32.totalorder %v1121_v1, 0  ;;  %v3212_v59 = vand.u32 3, %v996_v26  ;;  %v3216_v44 = vadd.f32 %v2962_v51, %v2781_v11 }
 0x266   :  { %v1110_v36 = vsel %vm1099_vm1, nan, %v1109_v33  ;;  %v982_v6 = vor.u32 4788187, %v981_v7  ;;  %v1123_v53 = vsel %vm1122_vm2, %v1121_v1, 0  ;;  %v3207_v49 = vshrl.u32 %v1276_v35, 30 }
 0x267   :  { %v1958_v17 = vsel %vm1950_vm14, %v2870_v4, %v1110_v36  ;;  %v1125_v12 = vand.u32 31, %v1123_v53  ;;  %v985_v13 = vcvt.s32.f32 %v978_v41  ;;  %v1271_v4 = vadd.s32 %v3173_v38, %v3178_v46 }
 0x268   :  { %1974 = vst [vmem:[#allocation7 + $0x38] sm:$0xff] %v1958_v17  ;;  %v983_v52 = vand.u32 2147483647, %v982_v6  ;;  %v1278_v29 = vshll.u32 %v3207_v49, 30  ;;  %v1119_v57 = vor.u32 8388608, %v1118_v25  ;;  %v1124_v55 = vshrl.u32 %v1123_v53, 5 }
 0x269   :  { %v1126_v22 = vsub.s32 32, %v1125_v12  ;;  %v1128_v23 = vshll.u32 %v2346_v54, %v1125_v12  ;;  %v1131_v24 = vshll.u32 %v2347_v58, %v1125_v12  ;;  %v1134_v11 = vshll.u32 %v2348_v60, %v1125_v12 }
 0x26a   :  { %v986_v20 = vmul.f32 %v985_v13, %v983_v52  ;;  %v3219_v8 = vsub.s32 %v1275_v18, %v1278_v29  ;;  %v1137_v42 = vshll.u32 %v2349_v62, %v1125_v12  ;;  %v1140_v21 = vshll.u32 %v2350_v0, %v1125_v12 }
 0x26b   :  { %v1129_v3 = vshrl.u32 %v2347_v58, %v1126_v22  ;;  %v1132_v32 = vshrl.u32 %v2348_v60, %v1126_v22  ;;  %v1135_v14 = vshrl.u32 %v2349_v62, %v1126_v22  ;;  %v1138_v38 = vshrl.u32 %v2350_v0, %v1126_v22 }
 0x26c   :  { %v987_v56 = vxor.u32 2147483648, %v986_v20  ;;  %v1281_v39 = vsub.s32 0, %v3219_v8  ;;  %v1141_v15 = vshrl.u32 %v2351_v9, %v1126_v22  ;;  %vm1217_vm3 = vcmp.lt.s32.totalorder %v3057_v10, 0 }
 0x26d   :  { %v1130_v19 = vor.u32 %v1129_v3, %v1128_v23  ;;  %v1133_v27 = vor.u32 %v1132_v32, %v1131_v24  ;;  %v1136_v16 = vor.u32 %v1135_v14, %v1134_v11  ;;  %v1139_v50 = vor.u32 %v1138_v38, %v1137_v42 }
 0x26e   :  { %v988_v46 = vsel %vm905_vm7, %v987_v56, %v986_v20  ;;  %v2055_v37 = vmin.u32 %v1281_v39, %v3219_v8  ;;  %v3239_v1 = vshll.u32 %v1119_v57, 8  ;;  %v1426_v34 = vand.u32 2139095040, %v3216_v44 }
 0x26f   :  { %v991_v40 = vsel %vm3186_vm11, %v2966_v5, %v988_v46  ;;  %v1301_v63 = vsub.s32 4, %v3207_v49  ;;  %v1127_v41 = vshrl.u32 %v2346_v54, %v1126_v22  ;;  %v1142_v7 = vor.u32 %v1141_v15, %v1140_v21 }
 0x270   :  { %2234 = vcosq.f32 %v991_v40  ;;  %v1283_v18 = vclz %v2055_v37  ;;  %vm1143_vm4 = vcmp.lt.s32.totalorder %v1124_v55, 1  ;;  %vm1145_vm5 = vcmp.lt.s32.totalorder %v1124_v55, 3 }
 0x271   :  { %2236 = vsinq.f32 %v991_v40  ;;  %vm1146_vm6 = vcmp.lt.s32.totalorder %v1124_v55, 4  ;;  %v1151_v35 = vsel %vm1143_vm4, %v1130_v19, %v1133_v27  ;;  %v1155_v26 = vsel %vm1143_vm4, %v1133_v27, %v1136_v16 }
 0x272   :  { %v2056_v33 = vadd.s32 4294967294, %v1283_v18  ;;  %v1148_v36 = vsel %vm1146_vm6, %v1136_v16, 2102212464  ;;  %v1152_v6 = vsel %vm1146_vm6, %v1139_v50, 920167782  ;;  %vm999_vm8 = vcmp.eq.s32.totalorder %v3212_v59, 0 }
 0x273   :  { %v1156_v53 = vsel %vm1146_vm6, %v1142_v7, 1326507024  ;;  %vm3249_vm9 = vcmp.le.f32.partialorder %v1215_v61, 0.7853982  ;;  %vm1144_vm10 = vcmp.lt.s32.totalorder %v1124_v55, 2  ;;  %v1153_v25 = vsel %vm1145_vm5, %v1136_v16, %v1152_v6 }
 0x274   :  { %vm2057_vm7 = vcmp.lt.s32.totalorder %v2056_v33, 0  ;;  %v1157_v12 = vsel %vm1145_vm5, %v1139_v50, %v1156_v53  ;;  %vm998_vm12 = vcmp.lt.s32.totalorder %v3212_v59, 2  ;;  %v1147_v13 = vsel %vm1143_vm4, %v1127_v41, %v1130_v19 }
 0x275   :  { %v1286_v52 = vsel %vm2057_vm7, 0, %v2056_v33  ;;  %v1154_v29 = vsel %vm1144_vm10, %v1151_v35, %v1153_v25  ;;  %v1158_v22 = vsel %vm1144_vm10, %v1155_v26, %v1157_v12  ;;  %vm995_vm11 = vweird.f32 %v2966_v5 }
 0x276   :  { %v1287_v61 = vsub.s32 32, %v1286_v52  ;;  %v1291_v20 = vsub.s32 4294967266, %v1286_v52  ;;  %v1149_v57 = vsel %vm1145_vm5, %v1133_v27, %v1148_v36  ;;  %v1427_v3 = vshrl.u32 %v1426_v34, 23 }
 0x277   :  { %v3262_v56 = vmul.u32.u64.low %v3239_v1, %v1158_v22  ;;  %v3263_v23 = vmul.u32.u64.high %v3239_v1, %v1158_v22, %v3262_v56  ;;  %v3266_v32 = vmul.u32.u64.low %v3239_v1, %v1154_v29  ;;  %v3267_v14 = vmul.u32.u64.high %v3239_v1, %v1154_v29, %v3266_v32 }
 0x278   :  { %v1288_v39 = vshll.u32 %v3219_v8, %v1286_v52  ;;  %v1289_v24 = vshrl.u32 %v1271_v4, %v1287_v61  ;;  %v1292_v11 = vadd.s32 127, %v1291_v20  ;;  %v2062_v38 = vadd.s32 4294967169, %v1427_v3 }
 0x279   :  { %vm1002_vm13 = vcmp.eq.s32.totalorder %v3212_v59, 2  ;;  %v1302_v19 = vsel %vm1217_vm3, %v1301_v63, %v3207_v49  ;;  %v1150_v42 = vsel %vm1144_vm10, %v1147_v13, %v1149_v57  ;;  %v3278_v40 = vadd.f32 %v2962_v51, %v2842_v48 }
 0x27a   :  { %v2235_v46 = vpop.eup %2234  ;;  %v1290_v16 = vor.u32 %v1289_v24, %v1288_v39  ;;  %v1293_v8 = vshll.u32 %v1292_v11, 23  ;;  %v1433_v4 = vadd.s32 1, %v2062_v38  ;;  %vm1168_vm15 = vc.u32 %v3263_v23, %v3266_v32 }
 0x27b   :  { %v2237_v37 = vpop.eup %2236  ;;  %v1003_v27 = vxor.u32 2147483648, %v2235_v46  ;;  %v1169_v21 = vadd.s32 1, %v3267_v14  ;;  %v1423_v15 = vand.u32 2147483647, %v3216_v44  ;;  %v1166_v18 = vmul.u32 %v3239_v1, %v1150_v42 }
 0x27c   :  { %v1000_v50 = vxor.u32 2147483648, %v2237_v37  ;;  %v1294_v55 = vor.u32 4788187, %v1293_v8  ;;  %vm1434_vm0 = vcmp.gt.s32.totalorder %v1433_v4, 0  ;;  %v1304_v51 = vsel %vm3249_vm9, 0, %v1302_v19 }
 0x27d   :  { %v1004_v49 = vsel %vm1002_vm13, %v1003_v27, %v2237_v37  ;;  %v1170_v34 = vsel %vm1168_vm15, %v1169_v21, %v3267_v14  ;;  %v1435_v63 = vsel %vm1434_vm0, %v1433_v4, 0  ;;  %v1297_v33 = vcvt.s32.f32 %v1290_v16 }
 0x27e   :  { %v1001_v48 = vsel %vm999_vm8, %v2235_v46, %v1000_v50  ;;  %v1295_v7 = vand.u32 2147483647, %v1294_v55  ;;  %v1171_v35 = vadd.s32 %v1170_v34, %v1166_v18  ;;  %v1437_v1 = vand.u32 31, %v1435_v63 }
 0x27f   :  { %v1005_v41 = vsel %vm998_vm12, %v1001_v48, %v1004_v49  ;;  %v1430_v25 = vand.u32 8388607, %v1423_v15  ;;  %v1308_v12 = vadd.s32 3, %v1304_v51  ;;  %v1436_v59 = vshrl.u32 %v1435_v63, 5 }
 0x280   :  { %v1006_v36 = vsel %vm995_vm11, nan, %v1005_v41  ;;  %v1298_v26 = vmul.f32 %v1297_v33, %v1295_v7  ;;  %v1172_v53 = vadd.s32 536870912, %v1171_v35  ;;  %v1438_v52 = vsub.s32 32, %v1437_v1 }
 0x281   :  { %v1957_v6 = vsel %vm1950_vm14, %v2966_v5, %v1006_v36  ;;  %v1322_v13 = vand.u32 2139095040, %v3278_v40  ;;  %v1440_v61 = vshll.u32 %v2346_v54, %v1437_v1  ;;  %v1443_v20 = vshll.u32 %v2347_v58, %v1437_v1 }
 0x282   :  { %1973 = vst [vmem:[#allocation7 + $0x30] sm:$0xff] %v1957_v6  ;;  %v1299_v29 = vxor.u32 2147483648, %v1298_v26  ;;  %v3300_v22 = vshrl.u32 %v1172_v53, 30  ;;  %v1441_v5 = vshrl.u32 %v2347_v58, %v1438_v52  ;;  %v1444_v57 = vshrl.u32 %v2348_v60, %v1438_v52 }
 0x283   :  { %v1446_v3 = vshll.u32 %v2348_v60, %v1437_v1  ;;  %v1447_v56 = vshrl.u32 %v2349_v62, %v1438_v52  ;;  %v1449_v24 = vshll.u32 %v2349_v62, %v1437_v1  ;;  %v1450_v11 = vshrl.u32 %v2350_v0, %v1438_v52 }
 0x284   :  { %v1300_v14 = vsel %vm1217_vm3, %v1299_v29, %v1298_v26  ;;  %v1174_v39 = vshll.u32 %v3300_v22, 30  ;;  %v1442_v46 = vor.u32 %v1441_v5, %v1440_v61  ;;  %v1445_v37 = vor.u32 %v1444_v57, %v1443_v20 }
 0x285   :  { %v1303_v38 = vsel %vm3249_vm9, %v3057_v10, %v1300_v14  ;;  %v1448_v19 = vor.u32 %v1447_v56, %v1446_v3  ;;  %v1451_v27 = vor.u32 %v1450_v11, %v1449_v24  ;;  %v1431_v16 = vor.u32 8388608, %v1430_v25 }
 0x286   :  { %2238 = vcosq.f32 %v1303_v38  ;;  %v3316_v42 = vsub.s32 %v1171_v35, %v1174_v39  ;;  %v1452_v8 = vshll.u32 %v2350_v0, %v1437_v1  ;;  %v1453_v4 = vshrl.u32 %v2351_v9, %v1438_v52 }
 0x287   :  { %2240 = vsinq.f32 %v1303_v38  ;;  %v1309_v50 = vand.u32 3, %v1308_v12  ;;  %vm1458_vm1 = vcmp.lt.s32.totalorder %v1436_v59, 4  ;;  %v1323_v49 = vshrl.u32 %v1322_v13, 23 }
 0x288   :  { %v1177_v21 = vsub.s32 0, %v3316_v42  ;;  %v1439_v17 = vshrl.u32 %v2346_v54, %v1438_v52  ;;  %v1454_v55 = vor.u32 %v1453_v4, %v1452_v8  ;;  %vm1455_vm2 = vcmp.lt.s32.totalorder %v1436_v59, 1 }
 0x289   :  { %v1460_v18 = vsel %vm1458_vm1, %v1448_v19, 2102212464  ;;  %vm1457_vm3 = vcmp.lt.s32.totalorder %v1436_v59, 3  ;;  %v1463_v51 = vsel %vm1455_vm2, %v1442_v46, %v1445_v37  ;;  %v1464_v34 = vsel %vm1458_vm1, %v1451_v27, 920167782 }
 0x28a   :  { %v2051_v48 = vmin.u32 %v1177_v21, %v3316_v42  ;;  %v1465_v63 = vsel %vm1457_vm3, %v1448_v19, %v1464_v34  ;;  %v1467_v41 = vsel %vm1455_vm2, %v1445_v37, %v1448_v19  ;;  %v1468_v7 = vsel %vm1458_vm1, %v1454_v55, 1326507024 }
 0x28b   :  { %v1471_v33 = vshll.u32 %v1431_v16, 8  ;;  %vm1113_vm4 = vcmp.lt.s32.totalorder %v3168_v45, 0  ;;  %vm1456_vm5 = vcmp.lt.s32.totalorder %v1436_v59, 2  ;;  %v1459_v36 = vsel %vm1455_vm2, %v1439_v17, %v1442_v46 }
 0x28c   :  { %v1179_v35 = vclz %v2051_v48  ;;  %v1461_v1 = vsel %vm1457_vm3, %v1445_v37, %v1460_v18  ;;  %vm1307_vm6 = vweird.f32 %v3057_v10  ;;  %vm1310_vm8 = vcmp.lt.s32.totalorder %v1309_v50, 2 }
 0x28d   :  { %v1466_v6 = vsel %vm1456_vm5, %v1463_v51, %v1465_v63  ;;  %v1469_v26 = vsel %vm1457_vm3, %v1451_v27, %v1468_v7  ;;  %v2058_v53 = vadd.s32 4294967169, %v1323_v49  ;;  %v1462_v29 = vsel %vm1456_vm5, %v1459_v36, %v1461_v1 }
 0x28e   :  { %v2052_v25 = vadd.s32 4294967294, %v1179_v35  ;;  %v1470_v12 = vsel %vm1456_vm5, %v1467_v41, %v1469_v26  ;;  %v3325_v52 = vmul.u32.u64.low %v1471_v33, %v1466_v6  ;;  %v3326_v13 = vmul.u32.u64.high %v1471_v33, %v1466_v6, %v3325_v52 }
 0x28f   :  { %v3329_v61 = vmul.u32.u64.low %v1471_v33, %v1470_v12  ;;  %v3330_v20 = vmul.u32.u64.high %v1471_v33, %v1470_v12, %v3329_v61  ;;  %v1329_v5 = vadd.s32 1, %v2058_v53  ;;  %vm1311_vm9 = vcmp.eq.s32.totalorder %v1309_v50, 0 }
 0x290   :  { %v2239_v59 = vpop.eup %2238  ;;  %vm1314_vm7 = vcmp.eq.s32.totalorder %v1309_v50, 2  ;;  %v1167_v57 = vadd.s32 %v3266_v32, %v3263_v23  ;;  %vm2053_vm10 = vcmp.lt.s32.totalorder %v2052_v25, 0  ;;  %v1197_v39 = vsub.s32 4, %v3300_v22 }
 0x291   :  { %v2241_v3 = vpop.eup %2240  ;;  %v1315_v56 = vxor.u32 2147483648, %v2239_v59  ;;  %v1182_v14 = vsel %vm2053_vm10, 0, %v2052_v25  ;;  %vm1330_vm12 = vcmp.gt.s32.totalorder %v1329_v5, 0  ;;  %v1478_v46 = vmul.u32 %v1471_v33, %v1462_v29  ;;  %v3362_v33 = vld [vmem:[%s3734_s2] ss:$0 sm:$0xff]  ;;  %s2353_s2 = smov [#allocation7]  }
 0x292   :  { %v1312_v24 = vxor.u32 2147483648, %v2241_v3  ;;  %v1183_v11 = vsub.s32 32, %v1182_v14  ;;  %v1187_v38 = vsub.s32 4294967266, %v1182_v14  ;;  %v1184_v37 = vshll.u32 %v3316_v42, %v1182_v14  ;;  %s1988_s18 = sshll.u32 %s2353_s2, 4  ;;  %s1989_s18 = int_to_ptr.vmem [resolvable:$true] %s1988_s18 }
 0x293   :  { %v1316_v19 = vsel %vm1314_vm7, %v1315_v56, %v2241_v3  ;;  %vm1480_vm11 = vc.u32 %v3330_v20, %v3325_v52  ;;  %v1481_v27 = vadd.s32 1, %v3326_v13  ;;  %v1331_v8 = vsel %vm1330_vm12, %v1329_v5, 0  ;;  %s2316_s19 = scalar_lea.vmem %s1989_s18, 2048  ;;  %p2321_p3 = scmp.lt.s32.totalorder %s1989_s18, %s1989_s18 }
 0x294   :  { %v1313_v23 = vsel %vm1311_vm9, %v2239_v59, %v1312_v24  ;;  %v1185_v32 = vshrl.u32 %v1167_v57, %v1183_v11  ;;  %v1188_v16 = vadd.s32 127, %v1187_v38  ;;  %v1198_v21 = vsel %vm1113_vm4, %v1197_v39, %v3300_v22  ;;  %p2317_p2 = scmp.ne.s32.totalorder %s1989_s18, %s2316_s19  ;;  %p2322_p4 = scmp.lt.s32.totalorder %s2316_s19, %s2316_s19 }
 0x295   :  { %v1317_v4 = vsel %vm1310_vm8, %v1313_v23, %v1316_v19  ;;  %v1482_v49 = vsel %vm1480_vm11, %v1481_v27, %v3326_v13  ;;  %v1333_v17 = vand.u32 31, %v1331_v8  ;;  %vm3352_vm13 = vcmp.le.f32.partialorder %v1111_v28, 0.7853982 }
 0x296   :  { %v1318_v42 = vsel %vm1307_vm6, nan, %v1317_v4  ;;  %v1186_v55 = vor.u32 %v1185_v32, %v1184_v37  ;;  %v1189_v18 = vshll.u32 %v1188_v16, 23  ;;  %v1483_v48 = vadd.s32 %v1482_v49, %v1478_v46  ;;  %p2323_p5 = por %p2322_p4, %p2321_p3 }
 0x297   :  { %v1960_v51 = vsel %vm1950_vm14, %v3057_v10, %v1318_v42  ;;  %v1319_v22 = vand.u32 2147483647, %v3278_v40  ;;  %v1334_v34 = vsub.s32 32, %v1333_v17  ;;  %v1200_v41 = vsel %vm3352_vm13, 0, %v1198_v21 }
 0x298   :  { %1976 = vst [vmem:[#allocation7 + $0x48] sm:$0xff] %v1960_v51  ;;  %v1190_v63 = vor.u32 4788187, %v1189_v18  ;;  %v1484_v7 = vadd.s32 536870912, %v1483_v48  ;;  %v3366_v10 = vadd.f32 %v3362_v33, %v2993_v47  ;;  %v1193_v28 = vcvt.s32.f32 %v1186_v55  ;;  %p2324_p6 = pnand %p2323_p5, %p2317_p2 }
 0x299   :  { %v1336_v35 = vshll.u32 %v2346_v54, %v1333_v17  ;;  %v1337_v36 = vshrl.u32 %v2347_v58, %v1334_v34  ;;  %v1340_v1 = vshrl.u32 %v2348_v60, %v1334_v34  ;;  %v1343_v53 = vshrl.u32 %v2349_v62, %v1334_v34 }
 0x29a   :  { %v1191_v6 = vand.u32 2147483647, %v1190_v63  ;;  %v3371_v26 = vshrl.u32 %v1484_v7, 30  ;;  %v1346_v25 = vshrl.u32 %v2350_v0, %v1334_v34  ;;  %v1326_v12 = vand.u32 8388607, %v1319_v22 }
 0x29b   :  { %v1332_v13 = vshrl.u32 %v1331_v8, 5  ;;  %v1339_v47 = vshll.u32 %v2347_v58, %v1333_v17  ;;  %v1345_v29 = vshll.u32 %v2349_v62, %v1333_v17  ;;  %v1338_v59 = vor.u32 %v1337_v36, %v1336_v35 }
 0x29c   :  { %v1194_v61 = vmul.f32 %v1193_v28, %v1191_v6  ;;  %v1486_v5 = vshll.u32 %v3371_v26, 30  ;;  %v1342_v57 = vshll.u32 %v2348_v60, %v1333_v17  ;;  %v1348_v14 = vshll.u32 %v2350_v0, %v1333_v17 }
 0x29d   :  { %v1341_v3 = vor.u32 %v1340_v1, %v1339_v47  ;;  %v1347_v56 = vor.u32 %v1346_v25, %v1345_v29  ;;  %v1349_v39 = vshrl.u32 %v2351_v9, %v1334_v34  ;;  %v1204_v11 = vadd.s32 3, %v1200_v41 }
 0x29e   :  { %v1195_v24 = vxor.u32 2147483648, %v1194_v61  ;;  %v3383_v38 = vsub.s32 %v1483_v48, %v1486_v5  ;;  %v1344_v46 = vor.u32 %v1343_v53, %v1342_v57  ;;  %v1327_v19 = vor.u32 8388608, %v1326_v12 }
 0x29f   :  { %v1335_v37 = vshrl.u32 %v2346_v54, %v1334_v34  ;;  %v1350_v27 = vor.u32 %v1349_v39, %v1348_v14  ;;  %v1634_v23 = vand.u32 2139095040, %v3366_v10  ;;  %vm1351_vm15 = vcmp.lt.s32.totalorder %v1332_v13, 1 }
 0x2a0   :  { %v1196_v32 = vsel %vm1113_vm4, %v1195_v24, %v1194_v61  ;;  %v1489_v16 = vsub.s32 0, %v3383_v38  ;;  %vm1354_vm0 = vcmp.lt.s32.totalorder %v1332_v13, 4  ;;  %vm1353_vm1 = vcmp.lt.s32.totalorder %v1332_v13, 3 }
 0x2a1   :  { %v1199_v8 = vsel %vm3352_vm13, %v3168_v45, %v1196_v32  ;;  %v1359_v4 = vsel %vm1351_vm15, %v1338_v59, %v1341_v3  ;;  %v1360_v21 = vsel %vm1354_vm0, %v1347_v56, 920167782  ;;  %v1356_v17 = vsel %vm1354_vm0, %v1344_v46, 2102212464 }
 0x2a2   :  { %2242 = vcosq.f32 %v1199_v8  ;;  %v2063_v49 = vmin.u32 %v1489_v16, %v3383_v38  ;;  %v1361_v42 = vsel %vm1353_vm1, %v1344_v46, %v1360_v21  ;;  %vm1352_vm2 = vcmp.lt.s32.totalorder %v1332_v13, 2 }
 0x2a3   :  { %2244 = vsinq.f32 %v1199_v8  ;;  %v1363_v55 = vsel %vm1351_vm15, %v1341_v3, %v1344_v46  ;;  %v1364_v18 = vsel %vm1354_vm0, %v1350_v27, 1326507024  ;;  %v1205_v48 = vand.u32 3, %v1204_v11 }
 0x2a4   :  { %v1491_v51 = vclz %v2063_v49  ;;  %v1355_v50 = vsel %vm1351_vm15, %v1335_v37, %v1338_v59  ;;  %v1362_v34 = vsel %vm1352_vm2, %v1359_v4, %v1361_v42  ;;  %v1357_v63 = vsel %vm1353_vm1, %v1341_v3, %v1356_v17 }
 0x2a5   :  { %v1365_v41 = vsel %vm1353_vm1, %v1347_v56, %v1364_v18  ;;  %v1367_v7 = vshll.u32 %v1327_v19, 8  ;;  %v1635_v28 = vshrl.u32 %v1634_v23, 23  ;;  %vm1425_vm3 = vcmp.lt.s32.totalorder %v3216_v44, 0 }
 0x2a6   :  { %v2064_v35 = vadd.s32 4294967294, %v1491_v51  ;;  %v1366_v36 = vsel %vm1352_vm2, %v1363_v55, %v1365_v41  ;;  %v3405_v1 = vadd.f32 %v3362_v33, %v3040_v43  ;;  %vm3416_vm4 = vcmp.le.f32.partialorder %v1423_v15, 0.7853982 }
 0x2a7   :  { %v3407_v6 = vmul.u32.u64.low %v1367_v7, %v1366_v36  ;;  %v3408_v53 = vmul.u32.u64.high %v1367_v7, %v1366_v36, %v3407_v6  ;;  %v3410_v25 = vmul.u32.u64.low %v1367_v7, %v1362_v34  ;;  %v3411_v12 = vmul.u32.u64.high %v1367_v7, %v1362_v34, %v3410_v25 }
 0x2a8   :  { %vm2065_vm5 = vcmp.lt.s32.totalorder %v2064_v35, 0  ;;  %v1358_v29 = vsel %vm1352_vm2, %v1355_v50, %v1357_v63  ;;  %v2070_v61 = vadd.s32 4294967169, %v1635_v28  ;;  %vm1206_vm6 = vcmp.lt.s32.totalorder %v1205_v48, 2 }
 0x2a9   :  { %vm1210_vm8 = vcmp.eq.s32.totalorder %v1205_v48, 2  ;;  %v1494_v43 = vsel %vm2065_vm5, 0, %v2064_v35  ;;  %v1509_v5 = vsub.s32 4, %v3371_v26  ;;  %v1479_v59 = vadd.s32 %v3325_v52, %v3330_v20 }
 0x2aa   :  { %v1495_v57 = vsub.s32 32, %v1494_v43  ;;  %v1499_v3 = vsub.s32 4294967266, %v1494_v43  ;;  %v1641_v56 = vadd.s32 1, %v2070_v61  ;;  %v1374_v14 = vmul.u32 %v1367_v7, %v1358_v29 }
 0x2ab   :  { %vm1376_vm9 = vc.u32 %v3408_v53, %v3410_v25  ;;  %v1377_v15 = vadd.s32 1, %v3411_v12  ;;  %v1631_v13 = vand.u32 2147483647, %v3366_v10  ;;  %v1496_v24 = vshll.u32 %v3383_v38, %v1494_v43 }
 0x2ac   :  { %v2243_v39 = vpop.eup %2242  ;;  %v1497_v11 = vshrl.u32 %v1479_v59, %v1495_v57  ;;  %v1500_v46 = vadd.s32 127, %v1499_v3  ;;  %vm1642_vm7 = vcmp.gt.s32.totalorder %v1641_v56, 0  ;;  %v1510_v52 = vsel %vm1425_vm3, %v1509_v5, %v3371_v26 }
 0x2ad   :  { %v2245_v19 = vpop.eup %2244  ;;  %v1211_v37 = vxor.u32 2147483648, %v2243_v39  ;;  %v1378_v20 = vsel %vm1376_vm9, %v1377_v15, %v3411_v12  ;;  %v1643_v27 = vsel %vm1642_vm7, %v1641_v56, 0  ;;  %vm1207_vm10 = vcmp.eq.s32.totalorder %v1205_v48, 0 }
 0x2ae   :  { %v1208_v23 = vxor.u32 2147483648, %v2245_v19  ;;  %v1498_v32 = vor.u32 %v1497_v11, %v1496_v24  ;;  %v1501_v16 = vshll.u32 %v1500_v46, 23  ;;  %v1379_v8 = vadd.s32 %v1378_v20, %v1374_v14 }
 0x2af   :  { %v1212_v4 = vsel %vm1210_vm8, %v1211_v37, %v2245_v19  ;;  %v1638_v38 = vand.u32 8388607, %v1631_v13  ;;  %v1645_v21 = vand.u32 31, %v1643_v27  ;;  %v1512_v42 = vsel %vm3416_vm4, 0, %v1510_v52 }
 0x2b0   :  { %v1209_v49 = vsel %vm1207_vm10, %v2243_v39, %v1208_v23  ;;  %v1502_v17 = vor.u32 4788187, %v1501_v16  ;;  %v1380_v26 = vadd.s32 536870912, %v1379_v8  ;;  %vm1203_vm12 = vweird.f32 %v3168_v45 }
 0x2b1   :  { %v1213_v55 = vsel %vm1206_vm6, %v1209_v49, %v1212_v4  ;;  %v1646_v18 = vsub.s32 32, %v1645_v21  ;;  %v1530_v51 = vand.u32 2139095040, %v3405_v1  ;;  %v1505_v63 = vcvt.s32.f32 %v1498_v32 }
 0x2b2   :  { %v1214_v50 = vsel %vm1203_vm12, nan, %v1213_v55  ;;  %v1503_v34 = vand.u32 2147483647, %v1502_v17  ;;  %v3441_v41 = vshrl.u32 %v1380_v26, 30  ;;  %v1516_v28 = vadd.s32 3, %v1512_v42 }
 0x2b3   :  { %v1959_v7 = vsel %vm1950_vm14, %v3168_v45, %v1214_v50  ;;  %v1639_v35 = vor.u32 8388608, %v1638_v38  ;;  %v1649_v36 = vshrl.u32 %v2347_v58, %v1646_v18  ;;  %v1652_v12 = vshrl.u32 %v2348_v60, %v1646_v18 }
 0x2b4   :  { %1975 = vst [vmem:[#allocation7 + $0x40] sm:$0xff] %v1959_v7  ;;  %v1506_v6 = vmul.f32 %v1505_v63, %v1503_v34  ;;  %v1382_v48 = vshll.u32 %v3441_v41, 30  ;;  %v1655_v29 = vshrl.u32 %v2349_v62, %v1646_v18  ;;  %v1644_v61 = vshrl.u32 %v1643_v27, 5 }
 0x2b5   :  { %v1648_v43 = vshll.u32 %v2346_v54, %v1645_v21  ;;  %v1658_v5 = vshrl.u32 %v2350_v0, %v1646_v18  ;;  %v1531_v59 = vshrl.u32 %v1530_v51, 23  ;;  %v1651_v3 = vshll.u32 %v2347_v58, %v1645_v21 }
 0x2b6   :  { %v1507_v57 = vxor.u32 2147483648, %v1506_v6  ;;  %v3452_v45 = vsub.s32 %v1379_v8, %v1382_v48  ;;  %v1654_v56 = vshll.u32 %v2348_v60, %v1645_v21  ;;  %v1657_v15 = vshll.u32 %v2349_v62, %v1645_v21 }
 0x2b7   :  { %v1650_v14 = vor.u32 %v1649_v36, %v1648_v43  ;;  %v1660_v39 = vshll.u32 %v2350_v0, %v1645_v21  ;;  %v1661_v24 = vshrl.u32 %v2351_v9, %v1646_v18  ;;  %v1653_v19 = vor.u32 %v1652_v12, %v1651_v3 }
 0x2b8   :  { %v1508_v11 = vsel %vm1425_vm3, %v1507_v57, %v1506_v6  ;;  %v1385_v46 = vsub.s32 0, %v3452_v45  ;;  %v1656_v37 = vor.u32 %v1655_v29, %v1654_v56  ;;  %v3465_v20 = vand.u32 3, %v1516_v28 }
 0x2b9   :  { %v1511_v52 = vsel %vm3416_vm4, %v3216_v44, %v1508_v11  ;;  %vm1321_vm11 = vcmp.lt.s32.totalorder %v3278_v40, 0  ;;  %v1659_v27 = vor.u32 %v1658_v5, %v1657_v15  ;;  %v1662_v23 = vor.u32 %v1661_v24, %v1660_v39 }
 0x2ba   :  { %2246 = vcosq.f32 %v1511_v52  ;;  %v2059_v32 = vmin.u32 %v1385_v46, %v3452_v45  ;;  %v1679_v16 = vshll.u32 %v1639_v35, 8  ;;  %v2066_v8 = vadd.s32 4294967169, %v1531_v59 }
 0x2bb   :  { %2248 = vsinq.f32 %v1511_v52  ;;  %v1647_v4 = vshrl.u32 %v2346_v54, %v1646_v18  ;;  %vm1663_vm13 = vcmp.lt.s32.totalorder %v1644_v61, 1  ;;  %vm1666_vm15 = vcmp.lt.s32.totalorder %v1644_v61, 4 }
 0x2bc   :  { %vm3472_vm0 = vcmp.le.f32.partialorder %v1319_v22, 0.7853982  ;;  %v1387_v38 = vclz %v2059_v32  ;;  %v1405_v21 = vsub.s32 4, %v3441_v41  ;;  %v1668_v49 = vsel %vm1666_vm15, %v1656_v37, 2102212464 }
 0x2bd   :  { %v1671_v17 = vsel %vm1663_vm13, %v1650_v14, %v1653_v19  ;;  %vm1665_vm1 = vcmp.lt.s32.totalorder %v1644_v61, 3  ;;  %v1672_v42 = vsel %vm1666_vm15, %v1659_v27, 920167782  ;;  %v1675_v26 = vsel %vm1663_vm13, %v1653_v19, %v1656_v37 }
 0x2be   :  { %v1676_v55 = vsel %vm1666_vm15, %v1662_v23, 1326507024  ;;  %v2060_v18 = vadd.s32 4294967294, %v1387_v38  ;;  %vm1664_vm2 = vcmp.lt.s32.totalorder %v1644_v61, 2  ;;  %v1673_v51 = vsel %vm1665_vm1, %v1656_v37, %v1672_v42 }
 0x2bf   :  { %v1677_v50 = vsel %vm1665_vm1, %v1659_v27, %v1676_v55  ;;  %vm1519_vm3 = vcmp.eq.s32.totalorder %v3465_v20, 0  ;;  %v1667_v22 = vsel %vm1663_vm13, %v1647_v4, %v1650_v14  ;;  %v1669_v34 = vsel %vm1665_vm1, %v1653_v19, %v1668_v49 }
 0x2c0   :  { %v1674_v63 = vsel %vm1664_vm2, %v1671_v17, %v1673_v51  ;;  %v1678_v7 = vsel %vm1664_vm2, %v1675_v26, %v1677_v50  ;;  %vm2061_vm4 = vcmp.lt.s32.totalorder %v2060_v18, 0  ;;  %v1537_v36 = vadd.s32 1, %v2066_v8 }
 0x2c1   :  { %v3483_v28 = vmul.u32.u64.low %v1679_v16, %v1678_v7  ;;  %v3484_v35 = vmul.u32.u64.high %v1679_v16, %v1678_v7, %v3483_v28  ;;  %v1375_v6 = vadd.s32 %v3410_v25, %v3408_v53  ;;  %v1390_v48 = vsel %vm2061_vm4, 0, %v2060_v18 }
 0x2c2   :  { %v3488_v12 = vmul.u32.u64.low %v1679_v16, %v1674_v63  ;;  %v3489_v29 = vmul.u32.u64.high %v1679_v16, %v1674_v63, %v3488_v12  ;;  %v1391_v43 = vsub.s32 32, %v1390_v48  ;;  %v1395_v5 = vsub.s32 4294967266, %v1390_v48 }
 0x2c3   :  { %v1406_v59 = vsel %vm1321_vm11, %v1405_v21, %v3441_v41  ;;  %vm1538_vm5 = vcmp.gt.s32.totalorder %v1537_v36, 0  ;;  %vm1522_vm6 = vcmp.eq.s32.totalorder %v3465_v20, 2  ;;  %v1670_v57 = vsel %vm1664_vm2, %v1667_v22, %v1669_v34 }
 0x2c4   :  { %v1527_v3 = vand.u32 2147483647, %v3405_v1  ;;  %v1539_v56 = vsel %vm1538_vm5, %v1537_v36, 0  ;;  %v2247_v53 = vpop.eup %2246  ;;  %v1392_v25 = vshll.u32 %v3452_v45, %v1390_v48  ;;  %v1393_v14 = vshrl.u32 %v1375_v6, %v1391_v43 }
 0x2c5   :  { %v1396_v15 = vadd.s32 127, %v1395_v5  ;;  %vm1688_vm8 = vc.u32 %v3484_v35, %v3488_v12  ;;  %v2249_v39 = vpop.eup %2248  ;;  %v1523_v24 = vxor.u32 2147483648, %v2247_v53  ;;  %v1408_v41 = vsel %vm3472_vm0, 0, %v1406_v59 }
 0x2c6   :  { %v1689_v11 = vadd.s32 1, %v3489_v29  ;;  %v1541_v61 = vand.u32 31, %v1539_v56  ;;  %v1520_v46 = vxor.u32 2147483648, %v2249_v39  ;;  %v1394_v19 = vor.u32 %v1393_v14, %v1392_v25 }
 0x2c7   :  { %v1397_v37 = vshll.u32 %v1396_v15, 23  ;;  %v1686_v52 = vmul.u32 %v1679_v16, %v1670_v57  ;;  %v1524_v45 = vsel %vm1522_vm6, %v1523_v24, %v2249_v39  ;;  %v1534_v23 = vand.u32 8388607, %v1527_v3 }
 0x2c8   :  { %v1690_v27 = vsel %vm1688_vm8, %v1689_v11, %v3489_v29  ;;  %v1542_v32 = vsub.s32 32, %v1541_v61  ;;  %vm1518_vm9 = vcmp.lt.s32.totalorder %v3465_v20, 2  ;;  %v1521_v8 = vsel %vm1519_vm3, %v2247_v53, %v1520_v46 }
 0x2c9   :  { %v1398_v4 = vor.u32 4788187, %v1397_v37  ;;  %v1691_v38 = vadd.s32 %v1690_v27, %v1686_v52  ;;  %vm1515_vm7 = vweird.f32 %v3216_v44  ;;  %v1525_v21 = vsel %vm1518_vm9, %v1521_v8, %v1524_v45 }
 0x2ca   :  { %v1412_v16 = vadd.s32 3, %v1408_v41  ;;  %v1526_v49 = vsel %vm1515_vm7, nan, %v1525_v21  ;;  %v1401_v42 = vcvt.s32.f32 %v1394_v19  ;;  %v1535_v18 = vor.u32 8388608, %v1534_v23 }
 0x2cb   :  { %v1399_v17 = vand.u32 2147483647, %v1398_v4  ;;  %v1692_v26 = vadd.s32 536870912, %v1691_v38  ;;  %v1962_v55 = vsel %vm1950_vm14, %v3216_v44, %v1526_v49  ;;  %v1545_v51 = vshrl.u32 %v2347_v58, %v1542_v32 }
 0x2cc   :  { %v1548_v20 = vshrl.u32 %v2348_v60, %v1542_v32  ;;  %1978 = vst [vmem:[#allocation7 + $0x58] sm:$0xff] %v1962_v55  ;;  %v1544_v34 = vshll.u32 %v2346_v54, %v1541_v61  ;;  %v1551_v63 = vshrl.u32 %v2349_v62, %v1542_v32  ;;  %v1547_v7 = vshll.u32 %v2347_v58, %v1541_v61 }
 0x2cd   :  { %v1402_v50 = vmul.f32 %v1401_v42, %v1399_v17  ;;  %v1693_v22 = vshrl.u32 %v1692_v26, 30  ;;  %v1553_v28 = vshll.u32 %v2349_v62, %v1541_v61  ;;  %v1554_v36 = vshrl.u32 %v2350_v0, %v1542_v32 }
 0x2ce   :  { %v1557_v44 = vshrl.u32 %v2351_v9, %v1542_v32  ;;  %v1540_v29 = vshrl.u32 %v1539_v56, 5  ;;  %v1550_v43 = vshll.u32 %v2348_v60, %v1541_v61  ;;  %v1546_v5 = vor.u32 %v1545_v51, %v1544_v34 }
 0x2cf   :  { %v1403_v6 = vxor.u32 2147483648, %v1402_v50  ;;  %v1694_v48 = vshll.u32 %v1693_v22, 30  ;;  %v1549_v59 = vor.u32 %v1548_v20, %v1547_v7  ;;  %v1555_v57 = vor.u32 %v1554_v36, %v1553_v28 }
 0x2d0   :  { %v1556_v53 = vshll.u32 %v2350_v0, %v1541_v61  ;;  %v1552_v15 = vor.u32 %v1551_v63, %v1550_v43  ;;  %v1575_v39 = vshll.u32 %v1535_v18, 8  ;;  %v1543_v56 = vshrl.u32 %v2346_v54, %v1542_v32 }
 0x2d1   :  { %v1404_v25 = vsel %vm1321_vm11, %v1403_v6, %v1402_v50  ;;  %v3528_v14 = vsub.s32 %v1691_v38, %v1694_v48  ;;  %v3536_v11 = vadd.f32 %v3362_v33, %v3122_v30  ;;  %vm1559_vm10 = vcmp.lt.s32.totalorder %v1540_v29, 1 }
 0x2d2   :  { %v1407_v24 = vsel %vm3472_vm0, %v3278_v40, %v1404_v25  ;;  %v1558_v41 = vor.u32 %v1557_v44, %v1556_v53  ;;  %vm1562_vm12 = vcmp.lt.s32.totalorder %v1540_v29, 4  ;;  %vm1561_vm11 = vcmp.lt.s32.totalorder %v1540_v29, 3 }
 0x2d3   :  { %2250 = vcosq.f32 %v1407_v24  ;;  %v1697_v61 = vsub.s32 0, %v3528_v14  ;;  %v1567_v46 = vsel %vm1559_vm10, %v1546_v5, %v1549_v59  ;;  %v1568_v19 = vsel %vm1562_vm12, %v1555_v57, 920167782 }
 0x2d4   :  { %2252 = vsinq.f32 %v1407_v24  ;;  %vm1560_vm13 = vcmp.lt.s32.totalorder %v1540_v29, 2  ;;  %v1564_v37 = vsel %vm1562_vm12, %v1552_v15, 2102212464  ;;  %v1569_v52 = vsel %vm1561_vm11, %v1552_v15, %v1568_v19 }
 0x2d5   :  { %v2071_v47 = vmin.u32 %v1697_v61, %v3528_v14  ;;  %v1717_v45 = vsub.s32 4, %v1693_v22  ;;  %v1570_v27 = vsel %vm1560_vm13, %v1567_v46, %v1569_v52  ;;  %v1571_v30 = vsel %vm1559_vm10, %v1549_v59, %v1552_v15 }
 0x2d6   :  { %v1572_v23 = vsel %vm1562_vm12, %v1558_v41, 1326507024  ;;  %v1413_v32 = vand.u32 3, %v1412_v16  ;;  %v1563_v4 = vsel %vm1559_vm10, %v1543_v56, %v1546_v5  ;;  %v1565_v38 = vsel %vm1561_vm11, %v1549_v59, %v1564_v37 }
 0x2d7   :  { %v1699_v8 = vclz %v2071_v47  ;;  %v1573_v21 = vsel %vm1561_vm11, %v1555_v57, %v1572_v23  ;;  %v3544_v49 = vmul.u32.u64.low %v1575_v39, %v1570_v27  ;;  %v3545_v17 = vmul.u32.u64.high %v1575_v39, %v1570_v27, %v3544_v49 }
 0x2d8   :  { %vm1633_vm15 = vcmp.lt.s32.totalorder %v3366_v10, 0  ;;  %v1574_v26 = vsel %vm1560_vm13, %v1571_v30, %v1573_v21  ;;  %v1842_v55 = vand.u32 2139095040, %v3536_v11  ;;  %vm1411_vm0 = vweird.f32 %v3278_v40 }
 0x2d9   :  { %v2072_v42 = vadd.s32 4294967294, %v1699_v8  ;;  %vm3554_vm1 = vcmp.le.f32.partialorder %v1631_v13, 0.7853982  ;;  %v1718_v18 = vsel %vm1633_vm15, %v1717_v45, %v1693_v22  ;;  %vm1418_vm2 = vcmp.eq.s32.totalorder %v1413_v32, 2 }
 0x2da   :  { %v3560_v51 = vmul.u32.u64.low %v1575_v39, %v1574_v26  ;;  %v3561_v20 = vmul.u32.u64.high %v1575_v39, %v1574_v26, %v3560_v51  ;;  %v1566_v50 = vsel %vm1560_vm13, %v1563_v4, %v1565_v38  ;;  %v1843_v34 = vshrl.u32 %v1842_v55, 23 }
 0x2db   :  { %vm2073_vm3 = vcmp.lt.s32.totalorder %v2072_v42, 0  ;;  %v1687_v63 = vadd.s32 %v3488_v12, %v3484_v35  ;;  %v1585_v13 = vadd.s32 1, %v3545_v17  ;;  %v1839_v28 = vand.u32 2147483647, %v3536_v11 }
 0x2dc   :  { %v1702_v7 = vsel %vm2073_vm3, 0, %v2072_v42  ;;  %v1720_v22 = vsel %vm3554_vm1, 0, %v1718_v18  ;;  %v2078_v48 = vadd.s32 4294967169, %v1843_v34  ;;  %v1582_v59 = vmul.u32 %v1575_v39, %v1566_v50 }
 0x2dd   :  { %v2251_v36 = vpop.eup %2250  ;;  %v1703_v44 = vsub.s32 32, %v1702_v7  ;;  %v1707_v6 = vsub.s32 4294967266, %v1702_v7  ;;  %v1704_v29 = vshll.u32 %v3528_v14, %v1702_v7  ;;  %vm1584_vm4 = vc.u32 %v3561_v20, %v3544_v49 }
 0x2de   :  { %v2253_v43 = vpop.eup %2252  ;;  %v1419_v5 = vxor.u32 2147483648, %v2251_v36  ;;  %v1586_v53 = vsel %vm1584_vm4, %v1585_v13, %v3545_v17  ;;  %vm1415_vm5 = vcmp.eq.s32.totalorder %v1413_v32, 0  ;;  %v1849_v24 = vadd.s32 1, %v2078_v48 }
 0x2df   :  { %v1416_v35 = vxor.u32 2147483648, %v2253_v43  ;;  %v1705_v12 = vshrl.u32 %v1687_v63, %v1703_v44  ;;  %v1708_v57 = vadd.s32 127, %v1707_v6  ;;  %v1587_v15 = vadd.s32 %v1586_v53, %v1582_v59 }
 0x2e0   :  { %v1420_v25 = vsel %vm1418_vm2, %v1419_v5, %v2253_v43  ;;  %vm1414_vm6 = vcmp.lt.s32.totalorder %v1413_v32, 2  ;;  %v1724_v14 = vadd.s32 3, %v1720_v22  ;;  %vm1850_vm8 = vcmp.gt.s32.totalorder %v1849_v24, 0 }
 0x2e1   :  { %v1417_v56 = vsel %vm1415_vm5, %v2251_v36, %v1416_v35  ;;  %v1706_v41 = vor.u32 %v1705_v12, %v1704_v29  ;;  %v1709_v61 = vshll.u32 %v1708_v57, 23  ;;  %v1588_v39 = vadd.s32 536870912, %v1587_v15 }
 0x2e2   :  { %v1421_v46 = vsel %vm1414_vm6, %v1417_v56, %v1420_v25  ;;  %v1846_v37 = vand.u32 8388607, %v1839_v28  ;;  %v1851_v52 = vsel %vm1850_vm8, %v1849_v24, 0  ;;  %v3586_v23 = vadd.f32 %v3362_v33, %v3197_v2 }
 0x2e3   :  { %v1422_v19 = vsel %vm1411_vm0, nan, %v1421_v46  ;;  %v1710_v47 = vor.u32 4788187, %v1709_v61  ;;  %v3582_v27 = vshrl.u32 %v1588_v39, 30  ;;  %v1853_v30 = vand.u32 31, %v1851_v52 }
 0x2e4   :  { %v1961_v45 = vsel %vm1950_vm14, %v3278_v40, %v1422_v19  ;;  %v1713_v8 = vcvt.s32.f32 %v1706_v41  ;;  %v3589_v17 = vand.u32 3, %v1724_v14  ;;  %v1847_v26 = vor.u32 8388608, %v1846_v37 }
 0x2e5   :  { %1977 = vst [vmem:[#allocation7 + $0x50] sm:$0xff] %v1961_v45  ;;  %v1711_v32 = vand.u32 2147483647, %v1710_v47  ;;  %v1590_v4 = vshll.u32 %v3582_v27, 30  ;;  %v1854_v38 = vsub.s32 32, %v1853_v30  ;;  %v1738_v55 = vand.u32 2139095040, %v3586_v23 }
 0x2e6   :  { %v1856_v2 = vshll.u32 %v2346_v54, %v1853_v30  ;;  %v1859_v34 = vshll.u32 %v2347_v58, %v1853_v30  ;;  %v1862_v63 = vshll.u32 %v2348_v60, %v1853_v30  ;;  %v1852_v36 = vshrl.u32 %v1851_v52, 5 }
 0x2e7   :  { %v1714_v21 = vmul.f32 %v1713_v8, %v1711_v32  ;;  %v3591_v42 = vsub.s32 %v1587_v15, %v1590_v4  ;;  %v1857_v40 = vshrl.u32 %v2347_v58, %v1854_v38  ;;  %v1860_v33 = vshrl.u32 %v2348_v60, %v1854_v38 }
 0x2e8   :  { %v1863_v51 = vshrl.u32 %v2349_v62, %v1854_v38  ;;  %v1866_v7 = vshrl.u32 %v2350_v0, %v1854_v38  ;;  %v1865_v6 = vshll.u32 %v2349_v62, %v1853_v30  ;;  %v1868_v59 = vshll.u32 %v2350_v0, %v1853_v30 }
 0x2e9   :  { %v1715_v18 = vxor.u32 2147483648, %v1714_v21  ;;  %v1593_v50 = vsub.s32 0, %v3591_v42  ;;  %v1858_v44 = vor.u32 %v1857_v40, %v1856_v2  ;;  %v1861_v43 = vor.u32 %v1860_v33, %v1859_v34 }
 0x2ea   :  { %v1864_v5 = vor.u32 %v1863_v51, %v1862_v63  ;;  %v1867_v29 = vor.u32 %v1866_v7, %v1865_v6  ;;  %v1869_v35 = vshrl.u32 %v2351_v9, %v1854_v38  ;;  %v1583_v12 = vadd.s32 %v3544_v49, %v3561_v20 }
 0x2eb   :  { %v1716_v13 = vsel %vm1633_vm15, %v1715_v18, %v1714_v21  ;;  %v2067_v48 = vmin.u32 %v1593_v50, %v3591_v42  ;;  %v1887_v53 = vshll.u32 %v1847_v26, 8  ;;  %v1855_v25 = vshrl.u32 %v2346_v54, %v1854_v38 }
 0x2ec   :  { %v1719_v22 = vsel %vm3554_vm1, %v3366_v10, %v1716_v13  ;;  %v1870_v16 = vor.u32 %v1869_v35, %v1868_v59  ;;  %vm1871_vm9 = vcmp.lt.s32.totalorder %v1852_v36, 1  ;;  %v1739_v15 = vshrl.u32 %v1738_v55, 23 }
 0x2ed   :  { %2254 = vcosq.f32 %v1719_v22  ;;  %v1595_v57 = vclz %v2067_v48  ;;  %vm1873_vm7 = vcmp.lt.s32.totalorder %v1852_v36, 3  ;;  %vm1874_vm10 = vcmp.lt.s32.totalorder %v1852_v36, 4 }
 0x2ee   :  { %2256 = vsinq.f32 %v1719_v22  ;;  %v1879_v56 = vsel %vm1871_vm9, %v1858_v44, %v1861_v43  ;;  %v1876_v41 = vsel %vm1874_vm10, %v1864_v5, 2102212464  ;;  %v1880_v61 = vsel %vm1874_vm10, %v1867_v29, 920167782 }
 0x2ef   :  { %v2068_v24 = vadd.s32 4294967294, %v1595_v57  ;;  %v1883_v46 = vsel %vm1871_vm9, %v1861_v43, %v1864_v5  ;;  %v1884_v14 = vsel %vm1874_vm10, %v1870_v16, 1326507024  ;;  %vm1872_vm11 = vcmp.lt.s32.totalorder %v1852_v36, 2 }
 0x2f0   :  { %v1881_v39 = vsel %vm1873_vm7, %v1864_v5, %v1880_v61  ;;  %v1885_v49 = vsel %vm1873_vm7, %v1867_v29, %v1884_v14  ;;  %v1875_v19 = vsel %vm1871_vm9, %v1855_v25, %v1858_v44  ;;  %vm1723_vm13 = vweird.f32 %v3366_v10 }
 0x2f1   :  { %vm2069_vm12 = vcmp.lt.s32.totalorder %v2068_v24, 0  ;;  %v1882_v47 = vsel %vm1872_vm11, %v1879_v56, %v1881_v39  ;;  %v1886_v37 = vsel %vm1872_vm11, %v1883_v46, %v1885_v49  ;;  %v1877_v30 = vsel %vm1873_vm7, %v1861_v43, %v1876_v41 }
 0x2f2   :  { %v1598_v20 = vsel %vm2069_vm12, 0, %v2068_v24  ;;  %v2074_v32 = vadd.s32 4294967169, %v1739_v15  ;;  %vm1529_vm15 = vcmp.lt.s32.totalorder %v3405_v1, 0  ;;  %vm1727_vm0 = vcmp.eq.s32.totalorder %v3589_v17, 0 }
 0x2f3   :  { %v1599_v52 = vsub.s32 32, %v1598_v20  ;;  %v1603_v45 = vsub.s32 4294967266, %v1598_v20  ;;  %v3621_v8 = vmul.u32.u64.low %v1887_v53, %v1886_v37  ;;  %v3622_v4 = vmul.u32.u64.high %v1887_v53, %v1886_v37, %v3621_v8 }
 0x2f4   :  { %v3624_v38 = vmul.u32.u64.low %v1887_v53, %v1882_v47  ;;  %v3625_v21 = vmul.u32.u64.high %v1887_v53, %v1882_v47, %v3624_v38  ;;  %v1600_v26 = vshll.u32 %v3591_v42, %v1598_v20  ;;  %v1745_v18 = vadd.s32 1, %v2074_v32 }
 0x2f5   :  { %v1601_v40 = vshrl.u32 %v1583_v12, %v1599_v52  ;;  %v1604_v55 = vadd.s32 127, %v1603_v45  ;;  %vm1730_vm1 = vcmp.eq.s32.totalorder %v3589_v17, 2  ;;  %v1878_v33 = vsel %vm1872_vm11, %v1875_v19, %v1877_v30 }
 0x2f6   :  { %v1735_v51 = vand.u32 2147483647, %v3586_v23  ;;  %vm1746_vm2 = vcmp.gt.s32.totalorder %v1745_v18, 0  ;;  %v1613_v42 = vsub.s32 4, %v3582_v27  ;;  %vm1896_vm3 = vc.u32 %v3622_v4, %v3624_v38 }
 0x2f7   :  { %v2255_v2 = vpop.eup %2254  ;;  %v1602_v63 = vor.u32 %v1601_v40, %v1600_v26  ;;  %v1605_v7 = vshll.u32 %v1604_v55, 23  ;;  %v1897_v44 = vadd.s32 1, %v3625_v21  ;;  %v1894_v48 = vmul.u32 %v1887_v53, %v1878_v33 }
 0x2f8   :  { %v2257_v50 = vpop.eup %2256  ;;  %v1731_v34 = vxor.u32 2147483648, %v2255_v2  ;;  %v1747_v36 = vsel %vm1746_vm2, %v1745_v18, 0  ;;  %vm1726_vm4 = vcmp.lt.s32.totalorder %v3589_v17, 2  ;;  %vm3645_vm5 = vcmp.le.f32.partialorder %v1527_v3, 0.7853982 }
 0x2f9   :  { %v1728_v13 = vxor.u32 2147483648, %v2257_v50  ;;  %v1606_v22 = vor.u32 4788187, %v1605_v7  ;;  %v1898_v5 = vsel %vm1896_vm3, %v1897_v44, %v3625_v21  ;;  %v1749_v29 = vand.u32 31, %v1747_v36 }
 0x2fa   :  { %v1732_v6 = vsel %vm1730_vm1, %v1731_v34, %v2257_v50  ;;  %v1609_v12 = vcvt.s32.f32 %v1602_v63  ;;  %v1899_v57 = vadd.s32 %v1898_v5, %v1894_v48  ;;  %v1742_v17 = vand.u32 8388607, %v1735_v51 }
 0x2fb   :  { %v1729_v43 = vsel %vm1727_vm0, %v2255_v2, %v1728_v13  ;;  %v1607_v35 = vand.u32 2147483647, %v1606_v22  ;;  %v1750_v16 = vsub.s32 32, %v1749_v29  ;;  %v1614_v56 = vsel %vm1529_vm15, %v1613_v42, %v3582_v27 }
 0x2fc   :  { %v1733_v59 = vsel %vm1726_vm4, %v1729_v43, %v1732_v6  ;;  %v1900_v41 = vadd.s32 536870912, %v1899_v57  ;;  %v1752_v3 = vshll.u32 %v2346_v54, %v1749_v29  ;;  %v1755_v46 = vshll.u32 %v2347_v58, %v1749_v29 }
 0x2fd   :  { %v1734_v25 = vsel %vm1723_vm13, nan, %v1733_v59  ;;  %v1610_v24 = vmul.f32 %v1609_v12, %v1607_v35  ;;  %v1753_v61 = vshrl.u32 %v2347_v58, %v1750_v16  ;;  %v1756_v14 = vshrl.u32 %v2348_v60, %v1750_v16 }
 0x2fe   :  { %v1964_v15 = vsel %vm1950_vm14, %v3366_v10, %v1734_v25  ;;  %v3661_v49 = vshrl.u32 %v1900_v41, 30  ;;  %v1759_v10 = vshrl.u32 %v2349_v62, %v1750_v16  ;;  %v1762_v20 = vshrl.u32 %v2350_v0, %v1750_v16 }
 0x2ff   :  { %1980 = vst [vmem:[#allocation7 + $0x68] sm:$0xff] %v1964_v15  ;;  %v1611_v39 = vxor.u32 2147483648, %v1610_v24  ;;  %v1616_v27 = vsel %vm3645_vm5, 0, %v1614_v56  ;;  %v1748_v19 = vshrl.u32 %v1747_v36, 5  ;;  %v1758_v47 = vshll.u32 %v2348_v60, %v1749_v29 }
 0x300   :  { %v1761_v37 = vshll.u32 %v2349_v62, %v1749_v29  ;;  %v1902_v52 = vshll.u32 %v3661_v49, 30  ;;  %v1754_v45 = vor.u32 %v1753_v61, %v1752_v3  ;;  %v1757_v30 = vor.u32 %v1756_v14, %v1755_v46 }
 0x301   :  { %v1612_v58 = vsel %vm1529_vm15, %v1611_v39, %v1610_v24  ;;  %v1764_v21 = vshll.u32 %v2350_v0, %v1749_v29  ;;  %v1765_v26 = vshrl.u32 %v2351_v9, %v1750_v16  ;;  %v1760_v40 = vor.u32 %v1759_v10, %v1758_v47 }
 0x302   :  { %v1615_v32 = vsel %vm3645_vm5, %v3405_v1, %v1612_v58  ;;  %v1763_v8 = vor.u32 %v1762_v20, %v1761_v37  ;;  %v1903_v60 = vsub.s32 %v1899_v57, %v1902_v52  ;;  %v1743_v62 = vor.u32 8388608, %v1742_v17 }
 0x303   :  { %2258 = vcosq.f32 %v1615_v32  ;;  %v1766_v55 = vor.u32 %v1765_v26, %v1764_v21  ;;  %v1620_v18 = vadd.s32 3, %v1616_v27  ;;  %vm1767_vm6 = vcmp.lt.s32.totalorder %v1748_v19, 1 }
 0x304   :  { %2260 = vsinq.f32 %v1615_v32  ;;  %v1905_v2 = vsub.s32 0, %v1903_v60  ;;  %vm1770_vm8 = vcmp.lt.s32.totalorder %v1748_v19, 4  ;;  %v1751_v33 = vshrl.u32 %v2346_v54, %v1750_v16 }
 0x305   :  { %vm1769_vm9 = vcmp.lt.s32.totalorder %v1748_v19, 3  ;;  %v1775_v50 = vsel %vm1767_vm6, %v1754_v45, %v1757_v30  ;;  %v1776_v34 = vsel %vm1770_vm8, %v1763_v8, 920167782  ;;  %vm1768_vm7 = vcmp.lt.s32.totalorder %v1748_v19, 2 }
 0x306   :  { %v2079_v63 = vmin.u32 %v1905_v2, %v1903_v60  ;;  %v1772_v0 = vsel %vm1770_vm8, %v1760_v40, 2102212464  ;;  %v1777_v9 = vsel %vm1769_vm9, %v1760_v40, %v1776_v34  ;;  %v1779_v13 = vsel %vm1767_vm6, %v1757_v30, %v1760_v40 }
 0x307   :  { %v1778_v7 = vsel %vm1768_vm7, %v1775_v50, %v1777_v9  ;;  %v1780_v42 = vsel %vm1770_vm8, %v1766_v55, 1326507024  ;;  %v1783_v44 = vshll.u32 %v1743_v62, 8  ;;  %v1621_v6 = vand.u32 3, %v1620_v18 }
 0x308   :  { %v1907_v22 = vclz %v2079_v63  ;;  %v1771_v48 = vsel %vm1767_vm6, %v1751_v33, %v1754_v45  ;;  %v1773_v36 = vsel %vm1769_vm9, %v1757_v30, %v1772_v0  ;;  %v1781_v54 = vsel %vm1769_vm9, %v1763_v8, %v1780_v42 }
 0x309   :  { %v3682_v43 = vmul.u32.u64.low %v1783_v44, %v1778_v7  ;;  %v3683_v5 = vmul.u32.u64.high %v1783_v44, %v1778_v7, %v3682_v43  ;;  %v1782_v59 = vsel %vm1768_vm7, %v1779_v13, %v1781_v54  ;;  %vm1622_vm10 = vcmp.lt.s32.totalorder %v1621_v6, 2 }
 0x30a   :  { %v2080_v29 = vadd.s32 4294967294, %v1907_v22  ;;  %v3686_v35 = vmul.u32.u64.low %v1783_v44, %v1782_v59  ;;  %v3687_v12 = vmul.u32.u64.high %v1783_v44, %v1782_v59, %v3686_v35  ;;  %vm1623_vm12 = vcmp.eq.s32.totalorder %v1621_v6, 0 }
 0x30b   :  { %v1774_v25 = vsel %vm1768_vm7, %v1771_v48, %v1773_v36  ;;  %vm1626_vm13 = vcmp.eq.s32.totalorder %v1621_v6, 2  ;;  %v1793_v15 = vadd.s32 1, %v3683_v5  ;;  %v1895_v56 = vadd.s32 %v3624_v38, %v3622_v4 }
 0x30c   :  { %vm2081_vm11 = vcmp.lt.s32.totalorder %v2080_v29, 0  ;;  %v1790_v14 = vmul.u32 %v1783_v44, %v1774_v25  ;;  %vm1792_vm15 = vc.u32 %v3687_v12, %v3682_v43  ;;  %vm1619_vm0 = vweird.f32 %v3405_v1 }
 0x30d   :  { %v2259_v57 = vpop.eup %2258  ;;  %v1910_v16 = vsel %vm2081_vm11, 0, %v2080_v29  ;;  %v1794_v27 = vsel %vm1792_vm15, %v1793_v15, %v3683_v5  ;;  %vm1841_vm1 = vcmp.lt.s32.totalorder %v3536_v11, 0  ;;  %vm1840_vm2 = vcmp.le.f32.partialorder %v1839_v28, 0.7853982 }
 0x30e   :  { %v2261_v53 = vpop.eup %2260  ;;  %v1627_v17 = vxor.u32 2147483648, %v2259_v57  ;;  %v1911_v41 = vsub.s32 32, %v1910_v16  ;;  %v1915_v3 = vsub.s32 4294967266, %v1910_v16  ;;  %v1912_v46 = vshll.u32 %v1903_v60, %v1910_v16 }
 0x30f   :  { %v1624_v24 = vxor.u32 2147483648, %v2261_v53  ;;  %v1795_v47 = vadd.s32 %v1794_v27, %v1790_v14  ;;  %v1925_v60 = vsub.s32 4, %v3661_v49  ;;  %v1791_v7 = vadd.s32 %v3682_v43, %v3687_v12 }
 0x310   :  { %v1628_v61 = vsel %vm1626_vm13, %v1627_v17, %v2261_v53  ;;  %v1913_v10 = vshrl.u32 %v1895_v56, %v1911_v41  ;;  %v1916_v20 = vadd.s32 127, %v1915_v3  ;;  %vm1931_vm8 = vweird.f32 %v3536_v11 }
 0x311   :  { %v1625_v39 = vsel %vm1623_vm12, %v2259_v57, %v1624_v24  ;;  %v1796_v52 = vadd.s32 536870912, %v1795_v47  ;;  %vm1737_vm9 = vcmp.lt.s32.totalorder %v3586_v23, 0  ;;  %vm1736_vm7 = vcmp.le.f32.partialorder %v1735_v51, 0.7853982 }
 0x312   :  { %v1629_v19 = vsel %vm1622_vm10, %v1625_v39, %v1628_v61  ;;  %v1914_v4 = vor.u32 %v1913_v10, %v1912_v46  ;;  %v1917_v38 = vshll.u32 %v1916_v20, 23  ;;  %vm1827_vm13 = vweird.f32 %v3586_v23 }
 0x313   :  { %v1630_v37 = vsel %vm1619_vm0, nan, %v1629_v19  ;;  %v1797_v30 = vshrl.u32 %v1796_v52, 30 }
 0x314   :  { %v1963_v58 = vsel %vm1950_vm14, %v3405_v1, %v1630_v37  ;;  %v1918_v45 = vor.u32 4788187, %v1917_v38  ;;  %v1921_v8 = vcvt.s32.f32 %v1914_v4  ;;  %v1926_v1 = vsel %vm1841_vm1, %v1925_v60, %v3661_v49 }
 0x315   :  { %1979 = vst [vmem:[#allocation7 + $0x60] sm:$0xff] %v1963_v58  ;;  %v1798_v21 = vshll.u32 %v1797_v30, 30  ;;  %v1928_v50 = vsel %vm1840_vm2, 0, %v1926_v1  ;;  %v1821_v15 = vsub.s32 4, %v1797_v30 }
 0x316   :  { %v1919_v32 = vand.u32 2147483647, %v1918_v45  ;;  %v1932_v0 = vadd.s32 3, %v1928_v50 }
 0x317   :  { %v1799_v40 = vsub.s32 %v1795_v47, %v1798_v21  ;;  %v1822_v41 = vsel %vm1737_vm9, %v1821_v15, %v1797_v30 }
 0x318   :  { %v1922_v26 = vmul.f32 %v1921_v8, %v1919_v32  ;;  %v1933_v44 = vand.u32 3, %v1932_v0  ;;  %v1824_v61 = vsel %vm1736_vm7, 0, %v1822_v41 }
 0x319   :  { %v1801_v55 = vsub.s32 0, %v1799_v40  ;;  %v1828_v46 = vadd.s32 3, %v1824_v61 }
 0x31a   :  { %v1923_v62 = vxor.u32 2147483648, %v1922_v26  ;;  %vm1938_vm4 = vcmp.eq.s32.totalorder %v1933_v44, 2  ;;  %vm1935_vm5 = vcmp.eq.s32.totalorder %v1933_v44, 0  ;;  %vm1934_vm6 = vcmp.lt.s32.totalorder %v1933_v44, 2 }
 0x31b   :  { %v2075_v33 = vmin.u32 %v1801_v55, %v1799_v40  ;;  %v1829_v14 = vand.u32 3, %v1828_v46 }
 0x31c   :  { %v1924_v18 = vsel %vm1841_vm1, %v1923_v62, %v1922_v26 }
 0x31d   :  { %v1927_v2 = vsel %vm1840_vm2, %v3536_v11, %v1924_v18  ;;  %v1803_v34 = vclz %v2075_v33  ;;  %vm1834_vm10 = vcmp.eq.s32.totalorder %v1829_v14, 2  ;;  %vm1831_vm12 = vcmp.eq.s32.totalorder %v1829_v14, 0 }
 0x31e   :  { %2262 = vcosq.f32 %v1927_v2  ;;  %vm1830_vm11 = vcmp.lt.s32.totalorder %v1829_v14, 2 }
 0x31f   :  { %2264 = vsinq.f32 %v1927_v2  ;;  %v2076_v63 = vadd.s32 4294967294, %v1803_v34 }
 0x321   :  { %vm2077_vm3 = vcmp.lt.s32.totalorder %v2076_v63, 0 }
 0x322   :  { %v1806_v9 = vsel %vm2077_vm3, 0, %v2076_v63 }
 0x323   :  { %v1807_v13 = vsub.s32 32, %v1806_v9  ;;  %v1811_v42 = vsub.s32 4294967266, %v1806_v9  ;;  %v1808_v28 = vshll.u32 %v1799_v40, %v1806_v9 }
 0x325   :  { %v1809_v6 = vshrl.u32 %v1791_v7, %v1807_v13  ;;  %v1812_v22 = vadd.s32 127, %v1811_v42 }
 0x327   :  { %v1810_v54 = vor.u32 %v1809_v6, %v1808_v28  ;;  %v1813_v5 = vshll.u32 %v1812_v22, 23 }
 0x328   :  { %v2263_v49 = vpop.eup %2262 }
 0x329   :  { %v2265_v48 = vpop.eup %2264  ;;  %v1939_v36 = vxor.u32 2147483648, %v2263_v49  ;;  %v1814_v35 = vor.u32 4788187, %v1813_v5  ;;  %v1817_v25 = vcvt.s32.f32 %v1810_v54 }
 0x32a   :  { %v1936_v29 = vxor.u32 2147483648, %v2265_v48 }
 0x32b   :  { %v1940_v59 = vsel %vm1938_vm4, %v1939_v36, %v2265_v48  ;;  %v1815_v12 = vand.u32 2147483647, %v1814_v35 }
 0x32c   :  { %v1937_v57 = vsel %vm1935_vm5, %v2263_v49, %v1936_v29 }
 0x32d   :  { %v1941_v43 = vsel %vm1934_vm6, %v1937_v57, %v1940_v59  ;;  %v1818_v16 = vmul.f32 %v1817_v25, %v1815_v12 }
 0x32e   :  { %v1942_v53 = vsel %vm1931_vm8, nan, %v1941_v43 }
 0x32f   :  { %v1966_v17 = vsel %vm1950_vm14, %v3536_v11, %v1942_v53  ;;  %v1819_v24 = vxor.u32 2147483648, %v1818_v16 }
 0x330   :  { %1982 = vst [vmem:[#allocation7 + $0x78] sm:$0xff] %v1966_v17 }
 0x331   :  { %v1820_v56 = vsel %vm1737_vm9, %v1819_v24, %v1818_v16 }
 0x332   :  { %v1823_v3 = vsel %vm1736_vm7, %v3586_v23, %v1820_v56 }
 0x333   :  { %2266 = vcosq.f32 %v1823_v3 }
 0x334   :  { %2268 = vsinq.f32 %v1823_v3 }
 0x33d   :  { %v2267_v39 = vpop.eup %2266 }
 0x33e   :  { %v2269_v11 = vpop.eup %2268  ;;  %v1835_v10 = vxor.u32 2147483648, %v2267_v39 }
 0x33f   :  { %v1832_v20 = vxor.u32 2147483648, %v2269_v11 }
 0x340   :  { %v1836_v27 = vsel %vm1834_vm10, %v1835_v10, %v2269_v11 }
 0x341   :  { %v1833_v51 = vsel %vm1831_vm12, %v2267_v39, %v1832_v20 }
 0x342   :  { %v1837_v19 = vsel %vm1830_vm11, %v1833_v51, %v1836_v27 }
 0x343   :  { %v1838_v47 = vsel %vm1827_vm13, nan, %v1837_v19 }
 0x344   :  { %v1965_v37 = vsel %vm1950_vm14, %v3586_v23, %v1838_v47 }
 0x345   :  { %1981 = vst [vmem:[#allocation7 + $0x70] sm:$0xff] %v1965_v37 }
 0x346   :  { %2327 = shalt.err (!%p2324_p6)
}
 0x347   :  { %s2328_s22 = scalar_lea.hbm %s3736_s4, 2048 }
 0x348   :  { %p2329_p7 = scmp.ne.s32.totalorder %s3736_s4, %s2328_s22  ;;  %p2332_p8 = scmp.lt.u32.totalorder %s2328_s22, %s3736_s4 }
 0x34a   :  { %p2334_p9 = pnand %p2332_p8, %p2329_p7 }
 0x34c   :  { %2337 = shalt.err (!%p2334_p9)
}
 0x34d   :  { %s2354_s27 = smov 128   ;;  %s2355_s28 = smov 8  }
 0x34e   :  { %1994 = dma.vmem_to_hbm [thread:$0]  %s1989_s18, 2048, %s3736_s4, [#allocation4], %s2354_s27, %s2354_s27, %s2355_s28  }
 0x34f   :  { %2342 = dma.done.wait [#allocation4], 2048  }
 0x350   :  { %2343 = vsyncadd [#allocation4], 4294965248 }
 0x351   :  { %1998 = vsyncpa [#allocation3], 1 }
 0x352   :  { %1999 = vsyncpa [#allocation6], 1 }
 0x353   :  { %2000 = vsyncpa [#allocation4], 1 }

</bundles_post_ra>
